<compile_context>
chip_gen: v5e
topology: v5e:2x2
jax: 0.10.0
libtpu: 0.0.40
codegen_flags: <defaults>
</compile_context>

<pallas_src>
import jax
import jax.numpy as jnp
import numpy as np
from jax.experimental import pallas as pl
from jax.experimental.pallas import tpu as pltpu


def _moe_kernel(x_ref, w_ref, p_ref, o_ref, acc_ref):
    """One (row-tile, expert-group) grid step.

    x_ref:   (tile, d)     bf16  row tile of tokens
    w_ref:   (d, G*d)      bf16  G consecutive experts' weight columns
    p_ref:   (tile, G)     f32   mask-folded gating probs for this group
    o_ref:   (tile, d)     out dtype, written on the last expert-group step
    acc_ref: (tile, d)     f32   VMEM accumulator, resident across the eg axis
    """
    eg = pl.program_id(1)
    d = o_ref.shape[-1]
    g_per_step = p_ref.shape[-1]

    @pl.when(eg == 0)
    def _():
        acc_ref[...] = jnp.zeros_like(acc_ref)

    x = x_ref[...]
    p = p_ref[...]
    acc = acc_ref[...]
    # Per-expert (tile, d) x (d, d) MXU dots with f32 accumulation.  The
    # gating scale multiplies the f32 product (matches module numerics) and
    # only one (tile, d) f32 intermediate is live at a time.
    for g in range(g_per_step):
        y = jnp.dot(x, w_ref[:, g * d:(g + 1) * d],
                    preferred_element_type=jnp.float32)
        acc = acc + y * p[:, g:g + 1]
    acc_ref[...] = acc

    @pl.when(eg == pl.num_programs(1) - 1)
    def _():
        o_ref[...] = acc.astype(o_ref.dtype)


# ----------------------------- chip-aware tiling -----------------------------

def _detect_chip():
    vmem_cap = 64 * 1024 * 1024          # conservative default (v7x per-TC)
    kind = ""
    try:
        vmem_cap = int(pltpu.get_tpu_info().vmem_capacity_bytes)
    except Exception:
        pass
    try:
        kind = jax.devices()[0].device_kind.lower()
    except Exception:
        pass
    is_v5e = ("v5e" in kind) or ("v5 lite" in kind) or ("v5lite" in kind)
    multi_core = "v7" in kind            # v7x: 2 TensorCores per chip
    return vmem_cap, is_v5e, multi_core


def _vmem_limit(vmem_cap):
    if vmem_cap <= 64 * 1024 * 1024:
        # v7x-class parts: leave ample headroom for Mosaic internal scratch.
        return int(vmem_cap * 0.6)
    # 128 MiB parts (v5e / v6e): raise the scoped limit well past the default.
    return min(int(vmem_cap * 0.75), 100 * 1024 * 1024)


def _choose_experts_per_step(d, num_experts, vmem_limit):
    # Prefer making the whole weight a single VMEM-resident group
    # (n_groups == 1): it is then DMA'd exactly once instead of once per row
    # block.  Budget ~60% of the VMEM limit for the double-buffered weight.
    per_buffer_budget = int(vmem_limit * 0.6) // 2
    g = max(1, min(num_experts, per_buffer_budget // (2 * d * d)))
    while num_experts % g:
        g -= 1
    return g


def _choose_m_tile(padded_b, d, g, out_bytes, vmem_limit, multi_core, is_v5e):
    weight_vmem = 2 * g * d * d * 2       # double-buffered bf16 weight group
    # Per tile row: x (2 bufs, bf16) + out (2 bufs) + probs (2 bufs, last dim
    # padded to 128 lanes, f32) + f32 accumulator scratch.
    per_row = 2 * d * 2 + 2 * d * out_bytes + 2 * 128 * 4 + d * 4
    avail = max(vmem_limit - weight_vmem, 128 * per_row)
    cap = 512 if is_v5e else 1024
    t = cap
    while t > 128 and (t * per_row > avail or t > padded_b):
        t //= 2
    if multi_core:
        # v7x only: keep >= 2 row blocks so the "parallel" rb axis can shard
        # across both TensorCores.  (If plain "parallel" turns out not to
        # split it, pltpu.CORE_PARALLEL on this axis is the fallback.)
        while t > 128 and padded_b < 2 * t:
            t //= 2
    return t


# ------------------------------- pallas_call ---------------------------------

def _sparse_moe_block_matmul(x_bf16, w_bf16, p_grouped, d_model, num_experts,
                             m_tile, experts_per_step, out_dtype, vmem_limit):
    new_b = x_bf16.shape[0]
    row_blocks = new_b // m_tile
    n_groups = num_experts // experts_per_step
    g = experts_per_step

    flops = 2 * new_b * d_model * num_experts * d_model
    weight_reads = 1 if n_groups == 1 else row_blocks * n_groups
    bytes_accessed = (x_bf16.size * 2
                      + w_bf16.size * 2 * weight_reads
                      + p_grouped.size * 4
                      + new_b * d_model * int(jnp.dtype(out_dtype).itemsize))

    return pl.pallas_call(
        _moe_kernel,
        out_shape=jax.ShapeDtypeStruct((new_b, d_model), out_dtype),
        grid_spec=pltpu.PrefetchScalarGridSpec(
            num_scalar_prefetch=0,
            grid=(row_blocks, n_groups),
            in_specs=[
                # x row tile (constant across eg -> fetched once per rb)
                pl.BlockSpec((m_tile, d_model), lambda rb, eg: (rb, 0)),
                # weight columns for this expert group; for n_groups == 1 the
                # block index is constant -> DMA'd once, VMEM-resident.
                pl.BlockSpec((d_model, g * d_model), lambda rb, eg: (0, eg)),
                # mask-folded gating probs, lane-compact (m_tile, G) block
                pl.BlockSpec((None, m_tile, g), lambda rb, eg: (eg, rb, 0)),
            ],
            out_specs=pl.BlockSpec((m_tile, d_model), lambda rb, eg: (rb, 0)),
            scratch_shapes=[pltpu.VMEM((m_tile, d_model), jnp.float32)],
        ),
        compiler_params=pltpu.CompilerParams(
            dimension_semantics=("parallel", "arbitrary"),
            vmem_limit_bytes=int(vmem_limit)),
        cost_estimate=pl.CostEstimate(flops=int(flops), transcendentals=0,
                                      bytes_accessed=int(bytes_accessed)),
    )(x_bf16, w_bf16, p_grouped)


# --------------------------------- wrapper -----------------------------------

def init_params(key, d_model, num_experts):
    k1, k2, k3 = jax.random.split(key, 3)
    weight = jax.random.normal(k1, (d_model, num_experts * d_model),
                               jnp.float32) * 0.01
    bound = 1.0 / np.sqrt(d_model)
    gate_w = jax.random.uniform(k2, (num_experts, d_model), jnp.float32,
                                -bound, bound)
    gate_b = jax.random.uniform(k3, (num_experts,), jnp.float32, -bound, bound)
    return dict(weight=weight, gate_w=gate_w, gate_b=gate_b)


def _gating_probs(logits, gating_type):
    if gating_type in ("softmax", "topk"):
        return jax.nn.softmax(logits, axis=-1)
    if gating_type == "sigmoid":
        return jax.nn.sigmoid(logits)
    if gating_type == "quadratic":
        return jax.nn.softmax(logits ** 2, axis=-1)
    if gating_type == "pioneer":
        return jax.nn.softmax(jnp.cos(logits) ** 2, axis=-1)
    # TODO(synk): sparsemax gating branch not implemented (unused by the
    # default 'topk' path).
    return jax.nn.softmax(logits, axis=-1)


def sparse_moe_forward(params, x, gating_type="topk", top_k=1, threshold=0.5):
    d_model = params["weight"].shape[0]
    num_experts = params["gate_w"].shape[0]
    if d_model % 128 != 0:
        raise ValueError("d_model must be a multiple of 128 for TPU lane tiling")
    B = x.shape[0]

    # --- gate + gating probs + routing mask (tiny glue, plain JAX) ---
    logits = x @ params["gate_w"].T + params["gate_b"]
    probs = _gating_probs(logits, gating_type)
    if gating_type == "topk":
        _, topinds = jax.lax.top_k(probs, top_k)
        mask = jnp.sum(jax.nn.one_hot(topinds, num_experts, dtype=probs.dtype),
                       axis=1)
    else:
        thr = (probs > threshold).astype(probs.dtype)
        sum_mask = thr.sum(axis=1, keepdims=True)
        mask = jnp.where(sum_mask == 0, jnp.ones_like(thr) / num_experts, thr)

    # --- block mask at the module's granularity (tile_size = d_model rows) ---
    pad0 = (d_model - B % d_model) % d_model
    x_p = jnp.concatenate([x, jnp.zeros((pad0, d_model), x.dtype)], axis=0)
    mask_p = jnp.concatenate([mask, jnp.zeros((pad0, num_experts), mask.dtype)],
                             axis=0)
    probs_p = jnp.concatenate(
        [probs, jnp.zeros((pad0, num_experts), probs.dtype)], axis=0)
    blocks0 = x_p.shape[0] // d_model
    mask_block = jnp.max(mask_p.reshape(blocks0, d_model, num_experts), axis=1)

    # Fold the block mask into the gating probs: exactly block_sparse_matmul's
    # forward semantics (block-level OR gate times per-row prob).
    p_eff = probs_p * jnp.repeat(mask_block, d_model, axis=0)

    # --- chip-aware tiling ---
    vmem_cap, is_v5e, multi_core = _detect_chip()
    vmem_limit = _vmem_limit(vmem_cap)
    experts_per_step = _choose_experts_per_step(d_model, num_experts, vmem_limit)
    n_groups = num_experts // experts_per_step
    out_bytes = int(jnp.dtype(x.dtype).itemsize)
    m_tile = _choose_m_tile(x_p.shape[0], d_model, experts_per_step, out_bytes,
                            vmem_limit, multi_core, is_v5e)

    pad1 = (-x_p.shape[0]) % m_tile
    if pad1:
        x_p = jnp.concatenate([x_p, jnp.zeros((pad1, d_model), x_p.dtype)],
                              axis=0)
        p_eff = jnp.concatenate(
            [p_eff, jnp.zeros((pad1, num_experts), p_eff.dtype)], axis=0)
    new_b = x_p.shape[0]

    # bf16 MXU operands; gating scales stay f32, regrouped lane-compact as
    # (n_groups, new_b, experts_per_step).
    x_bf16 = x_p.astype(jnp.bfloat16)
    w_bf16 = params["weight"].astype(jnp.bfloat16)
    p_grouped = jnp.transpose(
        p_eff.reshape(new_b, n_groups, experts_per_step).astype(jnp.float32),
        (1, 0, 2))

    out = _sparse_moe_block_matmul(x_bf16, w_bf16, p_grouped, d_model,
                                   num_experts, m_tile, experts_per_step,
                                   x.dtype, vmem_limit)
    # TODO(synk): for truly sparse routing (large E, top_k << E) sort/group
    # tokens by routed expert in the wrapper and drive the x/out index_maps
    # with scalar-prefetched group offsets (megablocks pattern) instead of
    # evaluating every expert for every row block.
    return out[:B]


def sparse_moe_reference(params, x, top_k=1):
    """Pure-JAX replica of the PyTorch forward (gating_type='topk'), with the
    matmul at the same bf16-in / f32-accumulate precision as the kernel."""
    d_model = params["weight"].shape[0]
    E = params["gate_w"].shape[0]
    B = x.shape[0]
    logits = x @ params["gate_w"].T + params["gate_b"]
    probs = jax.nn.softmax(logits, axis=-1)
    _, topinds = jax.lax.top_k(probs, top_k)
    mask = jnp.sum(jax.nn.one_hot(topinds, E, dtype=probs.dtype), axis=1)
    pad = (d_model - B % d_model) % d_model
    x_p = jnp.concatenate([x, jnp.zeros((pad, d_model), x.dtype)], axis=0)
    mask_p = jnp.concatenate([mask, jnp.zeros((pad, E), mask.dtype)], axis=0)
    new_B = x_p.shape[0]
    blocks = new_B // d_model
    mask_block = jnp.max(mask_p.reshape(blocks, d_model, E), axis=1)
    out_all = jnp.dot(x_p.astype(jnp.bfloat16),
                      params["weight"].astype(jnp.bfloat16),
                      preferred_element_type=jnp.float32)
    out_all = out_all.reshape(new_B, E, d_model)
    mb_rows = jnp.repeat(mask_block, d_model, axis=0)          # (new_B, E)
    out_all = out_all * mb_rows[:, :, None]
    out_all = out_all[:B]
    return (out_all * probs[:, :, None]).sum(axis=1)


if __name__ == "__main__":
    d_model, num_experts, B = 128, 4, 200   # module tile_size = d_model = 128
    key = jax.random.PRNGKey(0)
    pkey, xkey = jax.random.split(key)
    params = init_params(pkey, d_model, num_experts)
    x = jax.random.normal(xkey, (B, d_model), jnp.float32)

    out = sparse_moe_forward(params, x, gating_type="topk", top_k=1)
    out = jax.block_until_ready(out)
    assert out.shape == (B, d_model)
    assert out.dtype == x.dtype

    ref = sparse_moe_reference(params, x, top_k=1)
    np.testing.assert_allclose(np.asarray(out), np.asarray(ref),
                               rtol=2e-3, atol=2e-5)
    print("KERNEL_OK")
</pallas_src>

<mosaic_0001>
module attributes {stable_mosaic.version = 11 : i64} {
  func.func @_moe_kernel(%arg0: i32, %arg1: i32, %arg2: memref<256x128xbf16, #tpu.memory_space<vmem>>, %arg3: memref<128x512xbf16, #tpu.memory_space<vmem>>, %arg4: memref<1x256x4xf32, #tpu.memory_space<vmem>>, %arg5: memref<256x128xf32, #tpu.memory_space<vmem>>, %arg6: memref<256x128xf32, #tpu.memory_space<vmem>>) attributes {dimension_semantics = [#tpu.dimension_semantics<parallel>, #tpu.dimension_semantics<arbitrary>], iteration_bounds = array<i64: 1, 1>, scalar_prefetch = 0 : i64, scratch_operands = 1 : i64, tpu.core_type = #tpu.core_type<tc>, window_params = [{transform_indices = @transform_0, window_bounds = array<i64: 256, 128>}, {transform_indices = @transform_1, window_bounds = array<i64: 128, 512>}, {transform_indices = @transform_2, window_bounds = array<i64: 1, 256, 4>}, {transform_indices = @transform_3, window_bounds = array<i64: 256, 128>}]} {
    %c0_i32 = arith.constant 0 : i32
    %0 = arith.cmpi eq, %arg1, %c0_i32 : i32
    %1 = arith.extui %0 : i1 to i32
    %c0_i32_0 = arith.constant 0 : i32
    %2 = arith.cmpi ne, %1, %c0_i32_0 : i32
    scf.if %2 {
      %cst_19 = arith.constant 0.000000e+00 : f32
      %35 = vector.broadcast %cst_19 : f32 to vector<256x128xf32>
      %c0_20 = arith.constant 0 : index
      %c0_21 = arith.constant 0 : index
      %36 = vector.load %arg6[%c0_20, %c0_21] : memref<256x128xf32, #tpu.memory_space<vmem>>, vector<256x128xf32>
      tpu.vector_store %arg6[%c0_20, %c0_21], %35 {strides = array<i32>} : memref<256x128xf32, #tpu.memory_space<vmem>>, vector<256x128xf32>,
    } else {
    }
    %c0 = arith.constant 0 : index
    %c0_1 = arith.constant 0 : index
    %3 = vector.load %arg2[%c0, %c0_1] : memref<256x128xbf16, #tpu.memory_space<vmem>>, vector<256x128xbf16>
    %c0_2 = arith.constant 0 : index
    %c0_3 = arith.constant 0 : index
    %c0_4 = arith.constant 0 : index
    %4 = vector.load %arg4[%c0_2, %c0_3, %c0_4] : memref<1x256x4xf32, #tpu.memory_space<vmem>>, vector<1x256x4xf32>
    %5 = vector.shape_cast %4 : vector<1x256x4xf32> to vector<256x4xf32>
    %c0_5 = arith.constant 0 : index
    %c0_6 = arith.constant 0 : index
    %6 = vector.load %arg6[%c0_5, %c0_6] : memref<256x128xf32, #tpu.memory_space<vmem>>, vector<256x128xf32>
    %c0_7 = arith.constant 0 : index
    %c0_8 = arith.constant 0 : index
    %7 = vector.load %arg3[%c0_7, %c0_8] : memref<128x512xbf16, #tpu.memory_space<vmem>>, vector<128x128xbf16>
    %cst = arith.constant dense<0.000000e+00> : vector<256x128xf32>
    %8 = tpu.matmul %3, %7, %cst {dimension_numbers = #tpu.dot_dimension_numbers<[1], [0], [0], [1], [0, 0, 1, 1], [], []>} : vector<256x128xbf16>, vector<128x128xbf16>, vector<256x128xf32> -> vector<256x128xf32>
    %9 = vector.extract_strided_slice %5 {offsets = [0, 0], sizes = [256, 1], strides = [1, 1]} : vector<256x4xf32> to vector<256x1xf32>
    %10 = vector.broadcast %9 : vector<256x1xf32> to vector<256x128xf32>
    %11 = arith.mulf %8, %10 : vector<256x128xf32>
    %12 = arith.addf %6, %11 : vector<256x128xf32>
    %c0_9 = arith.constant 0 : index
    %c128 = arith.constant 128 : index
    %13 = vector.load %arg3[%c0_9, %c128] : memref<128x512xbf16, #tpu.memory_space<vmem>>, vector<128x128xbf16>
    %cst_10 = arith.constant dense<0.000000e+00> : vector<256x128xf32>
    %14 = tpu.matmul %3, %13, %cst_10 {dimension_numbers = #tpu.dot_dimension_numbers<[1], [0], [0], [1], [0, 0, 1, 1], [], []>} : vector<256x128xbf16>, vector<128x128xbf16>, vector<256x128xf32> -> vector<256x128xf32>
    %15 = vector.extract_strided_slice %5 {offsets = [0, 1], sizes = [256, 1], strides = [1, 1]} : vector<256x4xf32> to vector<256x1xf32>
    %16 = vector.broadcast %15 : vector<256x1xf32> to vector<256x128xf32>
    %17 = arith.mulf %14, %16 : vector<256x128xf32>
    %18 = arith.addf %12, %17 : vector<256x128xf32>
    %c0_11 = arith.constant 0 : index
    %c256 = arith.constant 256 : index
    %19 = vector.load %arg3[%c0_11, %c256] : memref<128x512xbf16, #tpu.memory_space<vmem>>, vector<128x128xbf16>
    %cst_12 = arith.constant dense<0.000000e+00> : vector<256x128xf32>
    %20 = tpu.matmul %3, %19, %cst_12 {dimension_numbers = #tpu.dot_dimension_numbers<[1], [0], [0], [1], [0, 0, 1, 1], [], []>} : vector<256x128xbf16>, vector<128x128xbf16>, vector<256x128xf32> -> vector<256x128xf32>
    %21 = vector.extract_strided_slice %5 {offsets = [0, 2], sizes = [256, 1], strides = [1, 1]} : vector<256x4xf32> to vector<256x1xf32>
    %22 = vector.broadcast %21 : vector<256x1xf32> to vector<256x128xf32>
    %23 = arith.mulf %20, %22 : vector<256x128xf32>
    %24 = arith.addf %18, %23 : vector<256x128xf32>
    %c0_13 = arith.constant 0 : index
    %c384 = arith.constant 384 : index
    %25 = vector.load %arg3[%c0_13, %c384] : memref<128x512xbf16, #tpu.memory_space<vmem>>, vector<128x128xbf16>
    %cst_14 = arith.constant dense<0.000000e+00> : vector<256x128xf32>
    %26 = tpu.matmul %3, %25, %cst_14 {dimension_numbers = #tpu.dot_dimension_numbers<[1], [0], [0], [1], [0, 0, 1, 1], [], []>} : vector<256x128xbf16>, vector<128x128xbf16>, vector<256x128xf32> -> vector<256x128xf32>
    %27 = vector.extract_strided_slice %5 {offsets = [0, 3], sizes = [256, 1], strides = [1, 1]} : vector<256x4xf32> to vector<256x1xf32>
    %28 = vector.broadcast %27 : vector<256x1xf32> to vector<256x128xf32>
    %29 = arith.mulf %26, %28 : vector<256x128xf32>
    %30 = arith.addf %24, %29 : vector<256x128xf32>
    %c0_15 = arith.constant 0 : index
    %c0_16 = arith.constant 0 : index
    %31 = vector.load %arg6[%c0_15, %c0_16] : memref<256x128xf32, #tpu.memory_space<vmem>>, vector<256x128xf32>
    tpu.vector_store %arg6[%c0_15, %c0_16], %30 {strides = array<i32>} : memref<256x128xf32, #tpu.memory_space<vmem>>, vector<256x128xf32>,
    %c0_i32_17 = arith.constant 0 : i32
    %32 = arith.cmpi eq, %arg1, %c0_i32_17 : i32
    %33 = arith.extui %32 : i1 to i32
    %c0_i32_18 = arith.constant 0 : i32
    %34 = arith.cmpi ne, %33, %c0_i32_18 : i32
    scf.if %34 {
      %c0_19 = arith.constant 0 : index
      %c0_20 = arith.constant 0 : index
      %35 = vector.load %arg5[%c0_19, %c0_20] : memref<256x128xf32, #tpu.memory_space<vmem>>, vector<256x128xf32>
      tpu.vector_store %arg5[%c0_19, %c0_20], %30 {strides = array<i32>} : memref<256x128xf32, #tpu.memory_space<vmem>>, vector<256x128xf32>,
    } else {
    }
    return
  }
  func.func @transform_0(%arg0: i32, %arg1: i32) -> (i32, i32) {
    %c0_i32 = arith.constant 0 : i32
    %c0_i32_0 = arith.constant 0 : i32
    return %arg0, %c0_i32 : i32, i32
  }
  func.func @transform_1(%arg0: i32, %arg1: i32) -> (i32, i32) {
    %c0_i32 = arith.constant 0 : i32
    %c0_i32_0 = arith.constant 0 : i32
    return %c0_i32, %arg1 : i32, i32
  }
  func.func @transform_2(%arg0: i32, %arg1: i32) -> (i32, i32, i32) {
    %c0_i32 = arith.constant 0 : i32
    %c0_i32_0 = arith.constant 0 : i32
    return %arg1, %arg0, %c0_i32 : i32, i32, i32
  }
  func.func @transform_3(%arg0: i32, %arg1: i32) -> (i32, i32) {
    %c0_i32 = arith.constant 0 : i32
    %c0_i32_0 = arith.constant 0 : i32
    return %arg0, %c0_i32 : i32, i32
  }
}

</mosaic_0001>

<bundles_post_ra>
// kernel: tpu_custom_call.1
= control target key start
LH: loop header
LB: loop body
LE: loop exit
PB: predicated region body
PF: predicated region fallthrough
CT: control target
= control target key end

     0   :  { %8 = vsyncpa [#allocation4], 0  ;;  %s3109_s0 = inlined_call_operand.hbm [shape: bf16[256,128], index: 0, kind: input, shape index: {}]   ;;  %s3110_s1 = inlined_call_operand.vmem [shape: bf16[128,512], index: 1, kind: input, shape index: {}]   ;;  %s3111_s2 = inlined_call_operand.vmem [shape: f32[1,256,4], index: 2, kind: input, shape index: {}]   ;;  %s3112_s3 = inlined_call_operand.hbm [shape: f32[256,128], index: 3, kind: output, shape index: {}]  }
   0x1   :  { %9 = vsyncpa [#allocation5], 0  ;;  %s14_s14 = sshll.u32 %s3109_s0, 4  ;;  %s2072_s15 = smov [#allocation3]   ;;  %s15_s14 = int_to_ptr.hbm [resolvable:$true] %s14_s14 }
   0x2   :  { %s16_s16 = sshll.u32 %s2072_s15, 4  ;;  %s2073_s17 = smov 64   ;;  %s17_s16 = int_to_ptr.vmem [resolvable:$true] %s16_s16 }
   0x3   :  { %s2074_s18 = smov 4  }
   0x4   :  { %22 = dma.hbm_to_vmem [thread:$0]  %s15_s14, 2048, %s17_s16, [#allocation4], %s2073_s17, %s2073_s17, %s2074_s18  }
   0x5   :  { %2068 = dma.done.wait [#allocation4], 2048  }
   0x6   :  { %2069 = vsyncadd [#allocation4], 4294965248  ;;  %v2075_v0 = vmov 0   ;;  %v2108_v1 = vld [vmem:[%s3111_s2 + $0x20] sm:$0xff]  ;;  %v2113_v2 = vld [vmem:[%s3111_s2 + $0x10] sm:$0xff]  ;;  %s1744_s19 = sshll.u32 %s3112_s3, 4  ;;  %s1745_s19 = int_to_ptr.hbm [resolvable:$true] %s1744_s19 }
   0x7   :  { %2009 = vset.pattern.permute.xlu2 %v2075_v0  ;;  %2008 = vset.pattern.permute.xlu1 %v2075_v0  ;;  %v2118_v3 = vld [vmem:[%s3111_s2] sm:$0xff]  ;;  %v1972_v5 = vld [vmem:[%s3110_s1 + $0xec] sm:$0xf0]  ;;  %v1980_v8 = vld [vmem:[%s3110_s1 + $0xf0] sm:$0xf0]  ;;  %s2080_s20 = smov 128  }
   0x8   :  { %2007 = vset.pattern.permute.xlu0 %v2075_v0  ;;  %434 = vperm.xlu2 %2009, %v2108_v1   ;;  %v1851_v4 = vld [vmem:[%s3110_s1 + $0xe0] sm:$0xf]  ;;  %v1883_v6 = vld [vmem:[%s3110_s1 + $0xe4] sm:$0xf]  ;;  %v1915_v9 = vld [vmem:[%s3110_s1 + $0xe8] sm:$0xf] }
   0x9   :  { %424 = vperm.xlu1 %2008, %v2113_v2   ;;  %414 = vperm.xlu0 %2007, %v2118_v3   ;;  %v1852_v7 = vor.u32 %v1972_v5, %v1851_v4  ;;  %v1988_v10 = vld [vmem:[%s3110_s1 + $0xf4] sm:$0xf0]  ;;  %v1884_v11 = vor.u32 %v1980_v8, %v1883_v6  ;;  %v1847_v13 = vld [vmem:[%s3110_s1 + $0xc0] sm:$0xf]  ;;  %v1971_v14 = vld [vmem:[%s3110_s1 + $0xcc] sm:$0xf0] }
   0xa   :  { %v1916_v12 = vor.u32 %v1988_v10, %v1915_v9  ;;  %v1879_v15 = vld [vmem:[%s3110_s1 + $0xc4] sm:$0xf]  ;;  %v1848_v16 = vor.u32 %v1971_v14, %v1847_v13  ;;  %v1979_v17 = vld [vmem:[%s3110_s1 + $0xd0] sm:$0xf0]  ;;  %v1911_v18 = vld [vmem:[%s3110_s1 + $0xc8] sm:$0xf] }
   0xb   :  { %323 = vmatpush.bf16.msra.mxu0 %v1852_v7  ;;  %v1987_v19 = vld [vmem:[%s3110_s1 + $0xd4] sm:$0xf0]  ;;  %700 = vmatpush.bf16.msra.mxu1 %v1884_v11  ;;  %v1880_v20 = vor.u32 %v1979_v17, %v1879_v15  ;;  %v2162_v22 = vld [vmem:[%s3111_s2 + $0x28] sm:$0xff]  ;;  %v1843_v24 = vld [vmem:[%s3110_s1 + $0xa0] sm:$0xf] }
   0xc   :  { %1045 = vmatpush.bf16.msra.mxu2 %v1916_v12  ;;  %v1912_v21 = vor.u32 %v1987_v19, %v1911_v18  ;;  %v2167_v23 = vld [vmem:[%s3111_s2 + $0x18] sm:$0xff]  ;;  %v1970_v25 = vld [vmem:[%s3110_s1 + $0xac] sm:$0xf0]  ;;  %v1875_v26 = vld [vmem:[%s3110_s1 + $0xa4] sm:$0xf] }
   0xd   :  { %v1978_v27 = vld [vmem:[%s3110_s1 + $0xb0] sm:$0xf0]  ;;  %v1907_v28 = vld [vmem:[%s3110_s1 + $0xa8] sm:$0xf]  ;;  %v1986_v29 = vld [vmem:[%s3110_s1 + $0xb4] sm:$0xf0]  ;;  %v1844_v31 = vor.u32 %v1970_v25, %v1843_v24 }
   0xe   :  { %v2190_v30 = vld [vmem:[%s3111_s2 + $0x8] sm:$0xff]  ;;  %v1876_v32 = vor.u32 %v1978_v27, %v1875_v26  ;;  %v1908_v33 = vor.u32 %v1986_v29, %v1907_v28  ;;  %v1839_v34 = vld [vmem:[%s3110_s1 + $0x80] sm:$0xf]  ;;  %v1969_v35 = vld [vmem:[%s3110_s1 + $0x8c] sm:$0xf0] }
   0xf   :  { %324 = vmatpush.bf16.msra.mxu0 %v1848_v16  ;;  %701 = vmatpush.bf16.msra.mxu1 %v1880_v20  ;;  %v1871_v36 = vld [vmem:[%s3110_s1 + $0x84] sm:$0xf]  ;;  %v1977_v37 = vld [vmem:[%s3110_s1 + $0x90] sm:$0xf0]  ;;  %v1903_v38 = vld [vmem:[%s3110_s1 + $0x88] sm:$0xf]  ;;  %v1840_v40 = vor.u32 %v1969_v35, %v1839_v34 }
  0x10   :  { %1046 = vmatpush.bf16.msra.mxu2 %v1912_v21  ;;  %439 = vperm.xlu2 %2009, %v2162_v22   ;;  %v1985_v39 = vld [vmem:[%s3110_s1 + $0x94] sm:$0xf0]  ;;  %v1872_v41 = vor.u32 %v1977_v37, %v1871_v36  ;;  %v1835_v43 = vld [vmem:[%s3110_s1 + $0x60] sm:$0xf]  ;;  %v1968_v44 = vld [vmem:[%s3110_s1 + $0x6c] sm:$0xf0] }
  0x11   :  { %429 = vperm.xlu1 %2008, %v2167_v23   ;;  %419 = vperm.xlu0 %2007, %v2190_v30   ;;  %v1904_v42 = vor.u32 %v1985_v39, %v1903_v38  ;;  %v1867_v45 = vld [vmem:[%s3110_s1 + $0x64] sm:$0xf]  ;;  %v1976_v46 = vld [vmem:[%s3110_s1 + $0x70] sm:$0xf0]  ;;  %v1899_v47 = vld [vmem:[%s3110_s1 + $0x68] sm:$0xf]  ;;  %v1836_v52 = vor.u32 %v1968_v44, %v1835_v43 }
  0x12   :  { %v1984_v48 = vld [vmem:[%s3110_s1 + $0x74] sm:$0xf0]  ;;  %v2234_v49 = vld [vmem:[%s3111_s2 + $0x40] sm:$0xff]  ;;  %v2244_v51 = vld [vmem:[%s3111_s2 + $0x30] sm:$0xff]  ;;  %v1868_v53 = vor.u32 %v1976_v46, %v1867_v45 }
  0x13   :  { %325 = vmatpush.bf16.msra.mxu0 %v1844_v31  ;;  %702 = vmatpush.bf16.msra.mxu1 %v1876_v32  ;;  %3123 = vst [vmem:[#allocation9_spill] sm:$0xff] %v2234_v49  ;;  %v2239_v50 = vld [vmem:[%s3111_s2 + $0x38] sm:$0xff]  ;;  %v1900_v54 = vor.u32 %v1984_v48, %v1899_v47  ;;  %v1831_v55 = vld [vmem:[%s3110_s1 + $0x40] sm:$0xf]  ;;  %v1967_v56 = vld [vmem:[%s3110_s1 + $0x4c] sm:$0xf0] }
  0x14   :  { %1047 = vmatpush.bf16.msra.mxu2 %v1908_v33  ;;  %3124 = vst [vmem:[#allocation10_spill] sm:$0xff] %v2239_v50  ;;  %v1863_v57 = vld [vmem:[%s3110_s1 + $0x44] sm:$0xf]  ;;  %v1975_v58 = vld [vmem:[%s3110_s1 + $0x50] sm:$0xf0]  ;;  %v1832_v62 = vor.u32 %v1967_v56, %v1831_v55  ;;  %v2300_v14 = vld [vmem:[%s3111_s2 + $0x58] sm:$0xff] }
  0x15   :  { %v1895_v59 = vld [vmem:[%s3110_s1 + $0x48] sm:$0xf]  ;;  %v1983_v60 = vld [vmem:[%s3110_s1 + $0x54] sm:$0xf0]  ;;  %v1827_v61 = vld [vmem:[%s3110_s1 + $0x20] sm:$0xf]  ;;  %v1864_v5 = vor.u32 %v1975_v58, %v1863_v57 }
  0x16   :  { %v1966_v63 = vld [vmem:[%s3110_s1 + $0x2c] sm:$0xf0]  ;;  %v1859_v0 = vld [vmem:[%s3110_s1 + $0x24] sm:$0xf]  ;;  %v1974_v4 = vld [vmem:[%s3110_s1 + $0x30] sm:$0xf0]  ;;  %v1896_v6 = vor.u32 %v1983_v60, %v1895_v59 }
  0x17   :  { %326 = vmatpush.bf16.msra.mxu0 %v1840_v40  ;;  %703 = vmatpush.bf16.msra.mxu1 %v1872_v41  ;;  %v1891_v7 = vld [vmem:[%s3110_s1 + $0x28] sm:$0xf]  ;;  %v1947_v8 = vld [vmem:[%s3110_s1 + $0xec] sm:$0xf]  ;;  %v1996_v9 = vld [vmem:[%s3110_s1 + $0xf8] sm:$0xf0]  ;;  %v1828_v17 = vor.u32 %v1966_v63, %v1827_v61  ;;  %v1860_v21 = vor.u32 %v1974_v4, %v1859_v0 }
  0x18   :  { %1048 = vmatpush.bf16.msra.mxu2 %v1904_v42  ;;  %454 = vperm.xlu2 %2009, %v2234_v49   ;;  %v1982_v10 = vld [vmem:[%s3110_s1 + $0x34] sm:$0xf0]  ;;  %v1948_v11 = vor.u32 %v1996_v9, %v1947_v8  ;;  %v1943_v12 = vld [vmem:[%s3110_s1 + $0xcc] sm:$0xf]  ;;  %v1995_v13 = vld [vmem:[%s3110_s1 + $0xd8] sm:$0xf0] }
  0x19   :  { %449 = vperm.xlu1 %2008, %v2239_v50   ;;  %444 = vperm.xlu0 %2007, %v2244_v51   ;;  %v2305_v15 = vld [vmem:[%s3111_s2 + $0x50] sm:$0xff]  ;;  %v2310_v16 = vld [vmem:[%s3111_s2 + $0x48] sm:$0xff]  ;;  %v1823_v18 = vld [vmem:[%s3110_s1] sm:$0xf]  ;;  %v1944_v20 = vor.u32 %v1995_v13, %v1943_v12  ;;  %v1892_v24 = vor.u32 %v1982_v10, %v1891_v7 }
  0x1a   :  { %v1965_v19 = vld [vmem:[%s3110_s1 + $0xc] sm:$0xf0]  ;;  %1390 = vmatpush.bf16.msra.mxu3 %v1948_v11  ;;  %v1855_v25 = vld [vmem:[%s3110_s1 + $0x4] sm:$0xf]  ;;  %v1939_v26 = vld [vmem:[%s3110_s1 + $0xac] sm:$0xf] }
  0x1b   :  { %327 = vmatpush.bf16.msra.mxu0 %v1836_v52  ;;  %704 = vmatpush.bf16.msra.mxu1 %v1868_v53  ;;  %v1994_v27 = vld [vmem:[%s3110_s1 + $0xb8] sm:$0xf0]  ;;  %v1973_v28 = vld [vmem:[%s3110_s1 + $0x10] sm:$0xf0]  ;;  %v1887_v29 = vld [vmem:[%s3110_s1 + $0x8] sm:$0xf]  ;;  %v1824_v32 = vor.u32 %v1965_v19, %v1823_v18 }
  0x1c   :  { %1049 = vmatpush.bf16.msra.mxu2 %v1900_v54  ;;  %v1981_v31 = vld [vmem:[%s3110_s1 + $0x14] sm:$0xf0]  ;;  %v1940_v33 = vor.u32 %v1994_v27, %v1939_v26  ;;  %v1856_v34 = vor.u32 %v1973_v28, %v1855_v25  ;;  %v1935_v36 = vld [vmem:[%s3110_s1 + $0x8c] sm:$0xf]  ;;  %v1993_v37 = vld [vmem:[%s3110_s1 + $0x98] sm:$0xf0] }
  0x1d   :  { %v1888_v35 = vor.u32 %v1981_v31, %v1887_v29  ;;  %v2348_v38 = vld [vmem:[%s3111_s2 + $0x70] sm:$0xff]  ;;  %v2353_v39 = vld [vmem:[%s3111_s2 + $0x68] sm:$0xff]  ;;  %v1949_v40 = vld [vmem:[#allocation3] sm:$0xff]  ;;  %v1936_v42 = vor.u32 %v1993_v37, %v1935_v36 }
  0x1e   :  { %1391 = vmatpush.bf16.msra.mxu3 %v1944_v20  ;;  %3125 = vst [vmem:[#allocation11_spill] sm:$0xff] %v2353_v39  ;;  %v2358_v41 = vld [vmem:[%s3111_s2 + $0x60] sm:$0xff]  ;;  %v1931_v43 = vld [vmem:[%s3110_s1 + $0x6c] sm:$0xf]  ;;  %v1992_v44 = vld [vmem:[%s3110_s1 + $0x78] sm:$0xf0] }
  0x1f   :  { %328 = vmatpush.bf16.msra.mxu0 %v1832_v62  ;;  %705 = vmatpush.bf16.msra.mxu1 %v1864_v5  ;;  %3126 = vst [vmem:[#allocation12_spill] sm:$0xff] %v2358_v41  ;;  %v1932_v45 = vor.u32 %v1992_v44, %v1931_v43  ;;  %v1927_v46 = vld [vmem:[%s3110_s1 + $0x4c] sm:$0xf]  ;;  %v1991_v47 = vld [vmem:[%s3110_s1 + $0x58] sm:$0xf0]  ;;  %v2383_v52 = vld [vmem:[%s3111_s2 + $0x80] sm:$0xff] }
  0x20   :  { %1050 = vmatpush.bf16.msra.mxu2 %v1896_v6  ;;  %469 = vperm.xlu2 %2009, %v2300_v14   ;;  %v2378_v48 = vld [vmem:[%s3111_s2 + $0x88] sm:$0xff]  ;;  %3127 = vst [vmem:[#allocation13_spill] sm:$0xff] %v2383_v52  ;;  %v2388_v53 = vld [vmem:[%s3111_s2 + $0x78] sm:$0xff]  ;;  %v1928_v54 = vor.u32 %v1991_v47, %v1927_v46  ;;  %v2408_v60 = vld [vmem:[%s3111_s2 + $0xa0] sm:$0xff]  ;;  %v2076_v20 = vmov 1  }
  0x21   :  { %464 = vperm.xlu1 %2008, %v2305_v15   ;;  %459 = vperm.xlu0 %2007, %v2310_v16   ;;  %v1923_v55 = vld [vmem:[%s3110_s1 + $0x2c] sm:$0xf]  ;;  %v1990_v56 = vld [vmem:[%s3110_s1 + $0x38] sm:$0xf0]  ;;  %v2418_v63 = vld [vmem:[%s3111_s2 + $0x90] sm:$0xff] }
  0x22   :  { %1392 = vmatpush.bf16.msra.mxu3 %v1940_v33  ;;  %v1924_v57 = vor.u32 %v1990_v56, %v1923_v55  ;;  %v1919_v58 = vld [vmem:[%s3110_s1 + $0xc] sm:$0xf]  ;;  %v1989_v59 = vld [vmem:[%s3110_s1 + $0x18] sm:$0xf0]  ;;  %v2431_v5 = vld [vmem:[%s3111_s2 + $0xb0] sm:$0xff]  ;;  %s2081_s1 = smov 8  }
  0x23   :  { %329 = vmatpush.bf16.msra.mxu0 %v1828_v17  ;;  %706 = vmatpush.bf16.msra.mxu1 %v1860_v21  ;;  %v2413_v61 = vld [vmem:[%s3111_s2 + $0x98] sm:$0xff]  ;;  %v1950_v62 = vld [vmem:[#allocation3 + $0x8] sm:$0xff]  ;;  %v1920_v0 = vor.u32 %v1989_v59, %v1919_v58  ;;  %3129 = vst [vmem:[#allocation15_spill] sm:$0xff] %v2431_v5  ;;  %v2444_v7 = vld [vmem:[%s3111_s2 + $0xd0] sm:$0xff] }
  0x24   :  { %1051 = vmatpush.bf16.msra.mxu2 %v1892_v24  ;;  %v2426_v4 = vld [vmem:[%s3111_s2 + $0xb8] sm:$0xff]  ;;  %v2436_v6 = vld [vmem:[%s3111_s2 + $0xa8] sm:$0xff]  ;;  %3130 = vst [vmem:[#allocation16_spill] sm:$0xff] %v2444_v7  ;;  %v1951_v9 = vld [vmem:[#allocation3 + $0x10] sm:$0xff] }
  0x25   :  { %3128 = vst [vmem:[#allocation14_spill] sm:$0xff] %v2426_v4  ;;  %v2449_v8 = vld [vmem:[%s3111_s2 + $0xc8] sm:$0xff]  ;;  %v2454_v10 = vld [vmem:[%s3111_s2 + $0xc0] sm:$0xff]  ;;  %v2472_v13 = vld [vmem:[%s3111_s2 + $0xd8] sm:$0xff] }
  0x26   :  { %1393 = vmatpush.bf16.msra.mxu3 %v1936_v42  ;;  %3131 = vst [vmem:[#allocation17_spill] sm:$0xff] %v2449_v8  ;;  %v2462_v11 = vld [vmem:[%s3111_s2 + $0xe8] sm:$0xff]  ;;  %v2467_v12 = vld [vmem:[%s3111_s2 + $0xe0] sm:$0xff]  ;;  %v2480_v17 = vld [vmem:[%s3111_s2 + $0xf8] sm:$0xff] }
  0x27   :  { %330 = vmatpush.bf16.msra.mxu0 %v1824_v32  ;;  %707 = vmatpush.bf16.msra.mxu1 %v1856_v34  ;;  %3132 = vst [vmem:[#allocation18_spill] sm:$0xff] %v2462_v11  ;;  %v2485_v18 = vld [vmem:[%s3111_s2 + $0xf0] sm:$0xff]  ;;  %v1952_v19 = vld [vmem:[#allocation3 + $0x18] sm:$0xff]  ;;  %v1953_v24 = vld [vmem:[#allocation3 + $0x20] sm:$0xff] }
  0x28   :  { %1052 = vmatpush.bf16.msra.mxu2 %v1888_v35  ;;  %484 = vperm.xlu2 %2009, %v2348_v38   ;;  %v1954_v27 = vld [vmem:[#allocation3 + $0x28] sm:$0xff]  ;;  %v1955_v35 = vld [vmem:[#allocation3 + $0x30] sm:$0xff] }
  0x29   :  { %479 = vperm.xlu1 %2008, %v2353_v39   ;;  %474 = vperm.xlu0 %2007, %v2358_v41  }
  0x2a   :  { %331 = vmatmul.bf16.vlgmr.msra.gmra.mxu0 %v1949_v40  ;;  %708 = vmatmul.bf16.vlgmr.msra.gmra.mxu1 %v1949_v40 }
  0x2b   :  { %1053 = vmatmul.bf16.vlgmr.msra.gmra.mxu2 %v1949_v40  ;;  %1394 = vmatpush.bf16.msra.mxu3 %v1932_v45  ;;  %v1956_v45 = vld [vmem:[#allocation3 + $0x38] sm:$0xff] }
  0x2f   :  { %1395 = vmatpush.bf16.msra.mxu3 %v1928_v54 }
  0x30   :  { %499 = vperm.xlu2 %2009, %v2378_v48  }
  0x31   :  { %494 = vperm.xlu1 %2008, %v2383_v52   ;;  %489 = vperm.xlu0 %2007, %v2388_v53  }
  0x33   :  { %1396 = vmatpush.bf16.msra.mxu3 %v1924_v57 }
  0x37   :  { %1397 = vmatpush.bf16.msra.mxu3 %v1920_v0  ;;  %v1957_v0 = vld [vmem:[#allocation3 + $0x40] sm:$0xff] }
  0x38   :  { %514 = vperm.xlu2 %2009, %v2408_v60  }
  0x39   :  { %509 = vperm.xlu1 %2008, %v2413_v61   ;;  %504 = vperm.xlu0 %2007, %v2418_v63  }
  0x3a   :  { %336 = vmatmul.bf16.gmra.mxu0 %v1950_v62  ;;  %713 = vmatmul.bf16.gmra.mxu1 %v1950_v62 }
  0x3b   :  { %1058 = vmatmul.bf16.gmra.mxu2 %v1950_v62  ;;  %1398 = vmatmul.bf16.vlgmr.msra.gmra.mxu3 %v1949_v40 }
  0x40   :  { %529 = vperm.xlu2 %2009, %v2426_v4  }
  0x41   :  { %524 = vperm.xlu1 %2008, %v2431_v5   ;;  %519 = vperm.xlu0 %2007, %v2436_v6  }
  0x48   :  { %544 = vperm.xlu2 %2009, %v2444_v7  }
  0x49   :  { %539 = vperm.xlu1 %2008, %v2449_v8   ;;  %534 = vperm.xlu0 %2007, %v2454_v10  }
  0x4a   :  { %341 = vmatmul.bf16.gmra.mxu0 %v1951_v9  ;;  %718 = vmatmul.bf16.gmra.mxu1 %v1951_v9 }
  0x4b   :  { %1063 = vmatmul.bf16.gmra.mxu2 %v1951_v9  ;;  %1403 = vmatmul.bf16.gmra.mxu3 %v1950_v62 }
  0x50   :  { %559 = vperm.xlu2 %2009, %v2462_v11  }
  0x51   :  { %554 = vperm.xlu1 %2008, %v2467_v12   ;;  %549 = vperm.xlu0 %2007, %v2472_v13  }
  0x58   :  { %2010 = vset.pattern.permute.xlu2 %v2076_v20 }
  0x59   :  { %569 = vperm.xlu1 %2008, %v2480_v17   ;;  %564 = vperm.xlu0 %2007, %v2485_v18  }
  0x5a   :  { %790 = vperm.xlu2 %2010, %v2118_v3   ;;  %346 = vmatmul.bf16.gmra.mxu0 %v1952_v19 }
  0x5b   :  { %723 = vmatmul.bf16.gmra.mxu1 %v1952_v19  ;;  %1068 = vmatmul.bf16.gmra.mxu2 %v1952_v19 }
  0x5c   :  { %1408 = vmatmul.bf16.gmra.mxu3 %v1951_v9 }
  0x61   :  { %2012 = vset.pattern.permute.xlu1 %v2076_v20  ;;  %2011 = vset.pattern.permute.xlu0 %v2076_v20 }
  0x62   :  { %798 = vperm.xlu1 %2012, %v2113_v2   ;;  %v2491_v21 = vpop.permute.xlu2 %434  ;;  %802 = vperm.xlu2 %2010, %v2167_v23  }
  0x63   :  { %794 = vperm.xlu0 %2011, %v2190_v30  }
  0x6a   :  { %806 = vperm.xlu1 %2012, %v2108_v1   ;;  %810 = vperm.xlu2 %2010, %v2162_v22   ;;  %v2498_v25 = vpop.permute.xlu2 %439 }
  0x6b   :  { %814 = vperm.xlu0 %2011, %v2244_v51   ;;  %351 = vmatmul.bf16.gmra.mxu0 %v1953_v24 }
  0x6c   :  { %728 = vmatmul.bf16.gmra.mxu1 %v1953_v24  ;;  %1073 = vmatmul.bf16.gmra.mxu2 %v1953_v24 }
  0x6d   :  { %1413 = vmatmul.bf16.gmra.mxu3 %v1952_v19 }
  0x72   :  { %818 = vperm.xlu1 %2012, %v2239_v50   ;;  %822 = vperm.xlu2 %2010, %v2234_v49   ;;  %v2503_v26 = vpop.permute.xlu2 %454 }
  0x73   :  { %826 = vperm.xlu0 %2011, %v2310_v16  }
  0x7a   :  { %830 = vperm.xlu1 %2012, %v2305_v15   ;;  %834 = vperm.xlu2 %2010, %v2300_v14   ;;  %v2510_v29 = vpop.permute.xlu2 %469 }
  0x7b   :  { %v2506_v28 = vpop.permute.xlu1 %424  ;;  %838 = vperm.xlu0 %2011, %v2358_v41   ;;  %v415_v31 = vpop.permute.xlu0 %414  ;;  %356 = vmatmul.bf16.gmra.mxu0 %v1954_v27 }
  0x7c   :  { %733 = vmatmul.bf16.gmra.mxu1 %v1954_v27  ;;  %1078 = vmatmul.bf16.gmra.mxu2 %v1954_v27 }
  0x7d   :  { %1418 = vmatmul.bf16.gmra.mxu3 %v1953_v24 }
  0x82   :  { %842 = vperm.xlu1 %2012, %v2353_v39   ;;  %846 = vperm.xlu2 %2010, %v2348_v38   ;;  %v2515_v32 = vpop.permute.xlu2 %484 }
  0x83   :  { %850 = vperm.xlu0 %2011, %v2388_v53   ;;  %v2517_v33 = vpop.permute.xlu1 %429  ;;  %v420_v34 = vpop.permute.xlu0 %419 }
  0x8a   :  { %854 = vperm.xlu1 %2012, %v2383_v52   ;;  %858 = vperm.xlu2 %2010, %v2378_v48   ;;  %v2522_v36 = vpop.permute.xlu2 %499 }
  0x8b   :  { %862 = vperm.xlu0 %2011, %v2418_v63   ;;  %3133 = vst [vmem:[#allocation19_spill] sm:$0xff] %v2522_v36  ;;  %v2524_v37 = vpop.permute.xlu1 %449  ;;  %361 = vmatmul.bf16.gmra.mxu0 %v1955_v35  ;;  %v2526_v40 = vpop.permute.xlu0 %444  ;;  %v1958_v36 = vld [vmem:[#allocation3 + $0x48] sm:$0xff] }
  0x8c   :  { %738 = vmatmul.bf16.gmra.mxu1 %v1955_v35  ;;  %1083 = vmatmul.bf16.gmra.mxu2 %v1955_v35 }
  0x8d   :  { %1423 = vmatmul.bf16.gmra.mxu3 %v1954_v27 }
  0x92   :  { %866 = vperm.xlu1 %2012, %v2413_v61   ;;  %870 = vperm.xlu2 %2010, %v2408_v60   ;;  %v2531_v42 = vpop.permute.xlu2 %514 }
  0x93   :  { %874 = vperm.xlu0 %2011, %v2436_v6   ;;  %3134 = vst [vmem:[#allocation20_spill] sm:$0xff] %v2531_v42  ;;  %v2533_v43 = vpop.permute.xlu1 %464  ;;  %v2535_v44 = vpop.permute.xlu0 %459 }
  0x9a   :  { %878 = vperm.xlu1 %2012, %v2431_v5   ;;  %882 = vperm.xlu2 %2010, %v2426_v4   ;;  %v2540_v46 = vpop.permute.xlu2 %529 }
  0x9b   :  { %886 = vperm.xlu0 %2011, %v2454_v10   ;;  %3135 = vst [vmem:[#allocation21_spill] sm:$0xff] %v2540_v46  ;;  %v2542_v47 = vpop.permute.xlu1 %479  ;;  %366 = vmatmul.bf16.gmra.mxu0 %v1956_v45  ;;  %v2544_v54 = vpop.permute.xlu0 %474 }
  0x9c   :  { %743 = vmatmul.bf16.gmra.mxu1 %v1956_v45  ;;  %1088 = vmatmul.bf16.gmra.mxu2 %v1956_v45 }
  0x9d   :  { %1428 = vmatmul.bf16.gmra.mxu3 %v1955_v35 }
  0xa2   :  { %890 = vperm.xlu1 %2012, %v2449_v8   ;;  %894 = vperm.xlu2 %2010, %v2444_v7   ;;  %v2549_v55 = vpop.permute.xlu2 %544 }
  0xa3   :  { %898 = vperm.xlu0 %2011, %v2472_v13   ;;  %3136 = vst [vmem:[#allocation22_spill] sm:$0xff] %v2549_v55  ;;  %v2551_v56 = vpop.permute.xlu1 %494  ;;  %v2553_v57 = vpop.permute.xlu0 %489 }
  0xa4   :  { %3137 = vst [vmem:[#allocation23_spill] sm:$0xff] %v2551_v56 }
  0xa5   :  { %3138 = vst [vmem:[#allocation24_spill] sm:$0xff] %v2553_v57 }
  0xa7   :  { %v332_v58 = vpop.f32.mrf.mxu0  ;;  %v709_v62 = vpop.f32.mrf.mxu1 }
  0xa8   :  { %v572_v59 = vmul.f32 %v415_v31, %v332_v58  ;;  %v2077_v58 = vmov 2  }
  0xaa   :  { %902 = vperm.xlu1 %2012, %v2467_v12   ;;  %906 = vperm.xlu2 %2010, %v2462_v11   ;;  %v2558_v9 = vpop.permute.xlu2 %559 }
  0xab   :  { %910 = vperm.xlu0 %2011, %v2485_v18   ;;  %3139 = vst [vmem:[#allocation25_spill] sm:$0xff] %v2558_v9  ;;  %v2560_v19 = vpop.permute.xlu1 %509  ;;  %371 = vmatmul.bf16.gmra.mxu0 %v1957_v0  ;;  %v2562_v20 = vpop.permute.xlu0 %504 }
  0xac   :  { %3140 = vst [vmem:[#allocation26_spill] sm:$0xff] %v2560_v19  ;;  %748 = vmatmul.bf16.gmra.mxu1 %v1957_v0  ;;  %1093 = vmatmul.bf16.gmra.mxu2 %v1957_v0 }
  0xad   :  { %3141 = vst [vmem:[#allocation27_spill] sm:$0xff] %v2562_v20  ;;  %1433 = vmatmul.bf16.gmra.mxu3 %v1956_v45 }
  0xae   :  { %v2564_v24 = vpop.f32.mrf.mxu2 }
  0xaf   :  { %v334_v27 = vpop.f32.mrf.mxu0  ;;  %v2568_v35 = vpop.f32.mrf.mxu1 }
  0xb0   :  { %v2566_v31 = vmul.f32 %v420_v34, %v334_v27 }
  0xb2   :  { %914 = vperm.xlu1 %2012, %v2480_v17   ;;  %2013 = vset.pattern.permute.xlu2 %v2077_v58 }
  0xb3   :  { %2014 = vset.pattern.permute.xlu0 %v2077_v58  ;;  %v2571_v9 = vpop.permute.xlu1 %524  ;;  %1135 = vperm.xlu2 %2013, %v2118_v3   ;;  %v2575_v55 = vpop.permute.xlu0 %519 }
  0xb4   :  { %3142 = vst [vmem:[#allocation28_spill] sm:$0xff] %v2571_v9  ;;  %1139 = vperm.xlu0 %2014, %v2190_v30   ;;  %v791_v46 = vpop.permute.xlu2 %790 }
  0xb5   :  { %3143 = vst [vmem:[#allocation29_spill] sm:$0xff] %v2575_v55  ;;  %v917_v42 = vmul.f32 %v791_v46, %v709_v62 }
  0xb6   :  { %v2577_v45 = vpop.f32.mrf.mxu2 }
  0xb7   :  { %3144 = vst [vmem:[#allocation30_spill] sm:$0xff] %v2577_v45  ;;  %v2579_v34 = vadd.f32 %v917_v42, %v572_v59  ;;  %v337_v27 = vpop.f32.mrf.mxu0  ;;  %v714_v20 = vpop.f32.mrf.mxu1 }
  0xb8   :  { %v574_v19 = vmul.f32 %v2506_v28, %v337_v27 }
  0xba   :  { %2015 = vset.pattern.permute.xlu1 %v2077_v58 }
  0xbb   :  { %1143 = vperm.xlu1 %2015, %v2113_v2   ;;  %v2583_v9 = vpop.permute.xlu1 %539  ;;  %376 = vmatmul.bf16.gmra.mxu0 %v1958_v36  ;;  %v2585_v56 = vpop.permute.xlu0 %534 }
  0xbc   :  { %3145 = vst [vmem:[#allocation31_spill] sm:$0xff] %v2583_v9  ;;  %753 = vmatmul.bf16.gmra.mxu1 %v1958_v36  ;;  %1098 = vmatmul.bf16.gmra.mxu2 %v1958_v36  ;;  %v803_v46 = vpop.permute.xlu2 %802 }
  0xbd   :  { %3146 = vst [vmem:[#allocation32_spill] sm:$0xff] %v2585_v56  ;;  %1147 = vperm.xlu2 %2013, %v2167_v23   ;;  %1159 = vperm.xlu0 %2014, %v2244_v51  }
  0xbe   :  { %v2589_v42 = vpop.f32.mrf.mxu2  ;;  %1438 = vmatmul.bf16.gmra.mxu3 %v1957_v0  ;;  %v2592_v27 = vpop.f32.mrf.mxu3 }
  0xbf   :  { %3147 = vst [vmem:[#allocation33_spill] sm:$0xff] %v2589_v42  ;;  %v339_v28 = vpop.f32.mrf.mxu0  ;;  %v716_v62 = vpop.f32.mrf.mxu1 }
  0xc0   :  { %v575_v59 = vmul.f32 %v2517_v33, %v339_v28  ;;  %v920_v58 = vmul.f32 %v803_v46, %v716_v62  ;;  %3148 = vst [vmem:[#allocation34_spill] sm:$0xff] %v2592_v27  ;;  %v1959_v46 = vld [vmem:[#allocation3 + $0x50] sm:$0xff] }
  0xc2   :  { %v2594_v9 = vadd.f32 %v920_v58, %v575_v59 }
  0xc3   :  { %1151 = vperm.xlu1 %2015, %v2108_v1   ;;  %v2597_v56 = vpop.permute.xlu1 %554  ;;  %v2599_v55 = vpop.permute.xlu0 %549 }
  0xc4   :  { %3149 = vst [vmem:[#allocation35_spill] sm:$0xff] %v2597_v56  ;;  %v811_v45 = vpop.permute.xlu2 %810 }
  0xc5   :  { %3150 = vst [vmem:[#allocation36_spill] sm:$0xff] %v2599_v55  ;;  %1155 = vperm.xlu2 %2013, %v2162_v22   ;;  %1171 = vperm.xlu0 %2014, %v2310_v16  }
  0xc6   :  { %v2603_v0 = vpop.f32.mrf.mxu2  ;;  %v2605_v62 = vpop.f32.mrf.mxu3 }
  0xc7   :  { %v342_v33 = vpop.f32.mrf.mxu0  ;;  %v719_v28 = vpop.f32.mrf.mxu1  ;;  %3151 = vst [vmem:[#allocation37_spill] sm:$0xff] %v2605_v62 }
  0xcb   :  { %1163 = vperm.xlu1 %2015, %v2239_v50   ;;  %v2608_v59 = vpop.permute.xlu1 %569  ;;  %381 = vmatmul.bf16.gmra.mxu0 %v1959_v46  ;;  %v2610_v1 = vpop.permute.xlu0 %564 }
  0xcc   :  { %3152 = vst [vmem:[#allocation38_spill] sm:$0xff] %v2608_v59  ;;  %758 = vmatmul.bf16.gmra.mxu1 %v1959_v46  ;;  %1103 = vmatmul.bf16.gmra.mxu2 %v1959_v46  ;;  %v823_v58 = vpop.permute.xlu2 %822 }
  0xcd   :  { %3153 = vst [vmem:[#allocation39_spill] sm:$0xff] %v2610_v1  ;;  %1167 = vperm.xlu2 %2013, %v2234_v49   ;;  %1183 = vperm.xlu0 %2014, %v2358_v41  }
  0xce   :  { %v2614_v56 = vpop.f32.mrf.mxu2  ;;  %1443 = vmatmul.bf16.gmra.mxu3 %v1958_v36  ;;  %v2617_v50 = vpop.f32.mrf.mxu3 }
  0xcf   :  { %3154 = vst [vmem:[#allocation40_spill] sm:$0xff] %v2614_v56  ;;  %v344_v55 = vpop.f32.mrf.mxu0  ;;  %v721_v27 = vpop.f32.mrf.mxu1 }
  0xd0   :  { %v577_v62 = vmul.f32 %v2498_v25, %v344_v55  ;;  %v922_v42 = vmul.f32 %v811_v45, %v721_v27  ;;  %3155 = vst [vmem:[#allocation41_spill] sm:$0xff] %v2617_v50 }
  0xd2   :  { %v2619_v59 = vadd.f32 %v922_v42, %v577_v62  ;;  %v1960_v62 = vld [vmem:[#allocation3 + $0x58] sm:$0xff] }
  0xd3   :  { %1175 = vperm.xlu1 %2015, %v2305_v15  }
  0xd4   :  { %v799_v1 = vpop.permute.xlu1 %798  ;;  %v2623_v57 = vpop.permute.xlu2 %834 }
  0xd5   :  { %1179 = vperm.xlu2 %2013, %v2300_v14   ;;  %v919_v49 = vmul.f32 %v799_v1, %v714_v20  ;;  %v795_v41 = vpop.permute.xlu0 %794  ;;  %1195 = vperm.xlu0 %2014, %v2388_v53   ;;  %v576_v1 = vmul.f32 %v2491_v21, %v342_v33 }
  0xd6   :  { %v918_v36 = vmul.f32 %v795_v41, %v2568_v35  ;;  %v2627_v25 = vpop.f32.mrf.mxu2  ;;  %v2634_v50 = vpop.f32.mrf.mxu3 }
  0xd7   :  { %v2629_v55 = vadd.f32 %v919_v49, %v574_v19  ;;  %v347_v42 = vpop.f32.mrf.mxu0  ;;  %3156 = vst [vmem:[#allocation42_spill] sm:$0xff] %v2634_v50 }
  0xd8   :  { %v2632_v45 = vadd.f32 %v918_v36, %v2566_v31  ;;  %v724_v27 = vpop.f32.mrf.mxu1  ;;  %v578_v31 = vmul.f32 %v2526_v40, %v347_v42 }
  0xdb   :  { %1187 = vperm.xlu1 %2015, %v2353_v39   ;;  %386 = vmatmul.bf16.gmra.mxu0 %v1960_v62 }
  0xdc   :  { %763 = vmatmul.bf16.gmra.mxu1 %v1960_v62  ;;  %v807_v20 = vpop.permute.xlu1 %806  ;;  %1108 = vmatmul.bf16.gmra.mxu2 %v1960_v62  ;;  %v2639_v41 = vpop.permute.xlu2 %846 }
  0xdd   :  { %1191 = vperm.xlu2 %2013, %v2348_v38   ;;  %v921_v49 = vmul.f32 %v807_v20, %v719_v28  ;;  %v815_v19 = vpop.permute.xlu0 %814  ;;  %1207 = vperm.xlu0 %2014, %v2418_v63  }
  0xde   :  { %v923_v35 = vmul.f32 %v815_v19, %v724_v27  ;;  %v2645_v50 = vpop.f32.mrf.mxu2  ;;  %1448 = vmatmul.bf16.gmra.mxu3 %v1959_v46 }
  0xdf   :  { %v2643_v36 = vadd.f32 %v921_v49, %v576_v1  ;;  %v349_v21 = vpop.f32.mrf.mxu0  ;;  %v2649_v39 = vpop.f32.mrf.mxu3  ;;  %v1961_v49 = vld [vmem:[#allocation3 + $0x60] sm:$0xff] }
  0xe0   :  { %v2647_v56 = vadd.f32 %v923_v35, %v578_v31  ;;  %v726_v33 = vpop.f32.mrf.mxu1  ;;  %3157 = vst [vmem:[#allocation43_spill] sm:$0xff] %v2649_v39  ;;  %v579_v20 = vmul.f32 %v2524_v37, %v349_v21 }
  0xe3   :  { %1199 = vperm.xlu1 %2015, %v2383_v52  }
  0xe4   :  { %v819_v28 = vpop.permute.xlu1 %818  ;;  %v2654_v42 = vpop.permute.xlu2 %858 }
  0xe5   :  { %1203 = vperm.xlu2 %2013, %v2378_v48   ;;  %v924_v40 = vmul.f32 %v819_v28, %v726_v33  ;;  %v827_v27 = vpop.permute.xlu0 %826  ;;  %1219 = vperm.xlu0 %2014, %v2436_v6  }
  0xe6   :  { %v2659_v1 = vpop.f32.mrf.mxu2 }
  0xe7   :  { %v2657_v46 = vadd.f32 %v924_v40, %v579_v20  ;;  %v2662_v52 = vpop.f32.mrf.mxu3 }
  0xe8   :  { %v352_v19 = vpop.f32.mrf.mxu0  ;;  %3158 = vst [vmem:[#allocation44_spill] sm:$0xff] %v2662_v52 }
  0xe9   :  { %v729_v31 = vpop.f32.mrf.mxu1  ;;  %v580_v35 = vmul.f32 %v2503_v26, %v352_v19 }
  0xea   :  { %v925_v39 = vmul.f32 %v823_v58, %v729_v31 }
  0xeb   :  { %1211 = vperm.xlu1 %2015, %v2413_v61   ;;  %391 = vmatmul.bf16.gmra.mxu0 %v1961_v49 }
  0xec   :  { %v2665_v37 = vadd.f32 %v925_v39, %v580_v35  ;;  %768 = vmatmul.bf16.gmra.mxu1 %v1961_v49  ;;  %v831_v21 = vpop.permute.xlu1 %830  ;;  %1113 = vmatmul.bf16.gmra.mxu2 %v1961_v49  ;;  %v2668_v33 = vpop.permute.xlu2 %870 }
  0xed   :  { %1215 = vperm.xlu2 %2013, %v2408_v60   ;;  %3159 = vst [vmem:[#allocation45_spill] sm:$0xff] %v2668_v33  ;;  %v839_v28 = vpop.permute.xlu0 %838  ;;  %1231 = vperm.xlu0 %2014, %v2454_v10  }
  0xee   :  { %1453 = vmatmul.bf16.gmra.mxu3 %v1960_v62 }
  0xef   :  { %v2671_v26 = vpop.f32.mrf.mxu2 }
  0xf0   :  { %v354_v58 = vpop.f32.mrf.mxu0  ;;  %v2674_v19 = vpop.f32.mrf.mxu3 }
  0xf1   :  { %v731_v20 = vpop.f32.mrf.mxu1  ;;  %v581_v40 = vmul.f32 %v2535_v44, %v354_v58  ;;  %3160 = vst [vmem:[#allocation46_spill] sm:$0xff] %v2674_v19  ;;  %v1962_v44 = vld [vmem:[#allocation3 + $0x68] sm:$0xff] }
  0xf2   :  { %v926_v39 = vmul.f32 %v827_v27, %v731_v20 }
  0xf3   :  { %1223 = vperm.xlu1 %2015, %v2431_v5  }
  0xf4   :  { %v2677_v31 = vadd.f32 %v926_v39, %v581_v40  ;;  %v2679_v35 = vpop.permute.xlu1 %842  ;;  %v2682_v33 = vpop.permute.xlu2 %882 }
  0xf5   :  { %1227 = vperm.xlu2 %2013, %v2426_v4   ;;  %3161 = vst [vmem:[#allocation47_spill] sm:$0xff] %v2682_v33  ;;  %v2684_v62 = vpop.permute.xlu0 %850  ;;  %1243 = vperm.xlu0 %2014, %v2472_v13  }
  0xf7   :  { %v2687_v52 = vpop.f32.mrf.mxu2 }
  0xf8   :  { %v357_v27 = vpop.f32.mrf.mxu0  ;;  %v2690_v40 = vpop.f32.mrf.mxu3 }
  0xf9   :  { %v734_v58 = vpop.f32.mrf.mxu1  ;;  %v582_v20 = vmul.f32 %v2533_v43, %v357_v27  ;;  %3162 = vst [vmem:[#allocation48_spill] sm:$0xff] %v2690_v40 }
  0xfa   :  { %v927_v19 = vmul.f32 %v831_v21, %v734_v58 }
  0xfb   :  { %1235 = vperm.xlu1 %2015, %v2449_v8   ;;  %396 = vmatmul.bf16.gmra.mxu0 %v1962_v44  ;;  %v2078_v8 = vmov 3  }
  0xfc   :  { %v2693_v39 = vadd.f32 %v927_v19, %v582_v20  ;;  %773 = vmatmul.bf16.gmra.mxu1 %v1962_v44  ;;  %v2695_v33 = vpop.permute.xlu1 %854  ;;  %1118 = vmatmul.bf16.gmra.mxu2 %v1962_v44  ;;  %v2698_v4 = vpop.permute.xlu2 %894 }
  0xfd   :  { %1239 = vperm.xlu2 %2013, %v2444_v7   ;;  %3163 = vst [vmem:[#allocation49_spill] sm:$0xff] %v2698_v4  ;;  %v2700_v5 = vpop.permute.xlu0 %862  ;;  %1255 = vperm.xlu0 %2014, %v2485_v18  }
  0xfe   :  { %1458 = vmatmul.bf16.gmra.mxu3 %v1961_v49 }
  0xff   :  { %v2703_v43 = vpop.f32.mrf.mxu2 }
 0x100   :  { %v359_v21 = vpop.f32.mrf.mxu0  ;;  %v2707_v20 = vpop.f32.mrf.mxu3 }
 0x101   :  { %v736_v27 = vpop.f32.mrf.mxu1  ;;  %v583_v19 = vmul.f32 %v2510_v29, %v359_v21  ;;  %3164 = vst [vmem:[#allocation50_spill] sm:$0xff] %v2707_v20 }
 0x102   :  { %v928_v58 = vmul.f32 %v2623_v57, %v736_v27  ;;  %v1963_v57 = vld [vmem:[#allocation3 + $0x70] sm:$0xff] }
 0x103   :  { %1247 = vperm.xlu1 %2015, %v2467_v12  }
 0x104   :  { %v2710_v40 = vadd.f32 %v928_v58, %v583_v19  ;;  %v2712_v4 = vpop.permute.xlu1 %866  ;;  %v2715_v7 = vpop.permute.xlu2 %906 }
 0x105   :  { %1251 = vperm.xlu2 %2013, %v2462_v11   ;;  %3165 = vst [vmem:[#allocation51_spill] sm:$0xff] %v2715_v7  ;;  %v2717_v49 = vpop.permute.xlu0 %874  ;;  %2017 = vset.pattern.permute.xlu0 %v2078_v8 }
 0x106   :  { %3166 = vst [vmem:[#allocation52_spill] sm:$0xff] %v2717_v49  ;;  %1484 = vperm.xlu0 %2017, %v2190_v30  }
 0x107   :  { %v2720_v29 = vpop.f32.mrf.mxu2 }
 0x108   :  { %v362_v21 = vpop.f32.mrf.mxu0  ;;  %v2723_v20 = vpop.f32.mrf.mxu3 }
 0x109   :  { %v739_v27 = vpop.f32.mrf.mxu1  ;;  %v584_v19 = vmul.f32 %v2544_v54, %v362_v21 }
 0x10a   :  { %v929_v58 = vmul.f32 %v839_v28, %v739_v27 }
 0x10b   :  { %1259 = vperm.xlu1 %2015, %v2480_v17   ;;  %401 = vmatmul.bf16.gmra.mxu0 %v1963_v57 }
 0x10c   :  { %v2726_v11 = vadd.f32 %v929_v58, %v584_v19  ;;  %778 = vmatmul.bf16.gmra.mxu1 %v1963_v57  ;;  %v2728_v7 = vpop.permute.xlu1 %878  ;;  %1123 = vmatmul.bf16.gmra.mxu2 %v1963_v57 }
 0x10d   :  { %3167 = vst [vmem:[#allocation53_spill] sm:$0xff] %v2728_v7  ;;  %2016 = vset.pattern.permute.xlu2 %v2078_v8  ;;  %v2730_v30 = vpop.permute.xlu0 %886  ;;  %v1136_v49 = vpop.permute.xlu2 %1135 }
 0x10e   :  { %3168 = vst [vmem:[#allocation54_spill] sm:$0xff] %v2730_v30  ;;  %1480 = vperm.xlu2 %2016, %v2118_v3   ;;  %1504 = vperm.xlu0 %2017, %v2244_v51   ;;  %v1262_v54 = vmul.f32 %v1136_v49, %v2564_v24 }
 0x10f   :  { %1463 = vmatmul.bf16.gmra.mxu3 %v1962_v44  ;;  %v2735_v28 = vpop.f32.mrf.mxu2 }
 0x110   :  { %v2738_v21 = vadd.f32 %v1262_v54, %v2579_v34  ;;  %v364_v27 = vpop.f32.mrf.mxu0  ;;  %v2742_v30 = vpop.f32.mrf.mxu3 }
 0x111   :  { %v741_v19 = vpop.f32.mrf.mxu1  ;;  %v585_v58 = vmul.f32 %v2542_v47, %v364_v27 }
 0x112   :  { %v930_v7 = vmul.f32 %v2679_v35, %v741_v19  ;;  %v1964_v35 = vld [vmem:[#allocation3 + $0x78] sm:$0xff] }
 0x113   :  { %2018 = vset.pattern.permute.xlu1 %v2078_v8 }
 0x114   :  { %v2744_v3 = vadd.f32 %v930_v7, %v585_v58  ;;  %1488 = vperm.xlu1 %2018, %v2113_v2   ;;  %v2747_v51 = vpop.permute.xlu1 %890 }
 0x115   :  { %3169 = vst [vmem:[#allocation55_spill] sm:$0xff] %v2747_v51  ;;  %v2749_v24 = vpop.permute.xlu0 %898 }
 0x116   :  { %1492 = vperm.xlu2 %2016, %v2167_v23   ;;  %1516 = vperm.xlu0 %2017, %v2310_v16  }
 0x117   :  { %v1148_v34 = vpop.permute.xlu2 %1147  ;;  %v2754_v44 = vpop.f32.mrf.mxu2 }
 0x118   :  { %v1265_v47 = vmul.f32 %v1148_v34, %v2603_v0  ;;  %v367_v49 = vpop.f32.mrf.mxu0  ;;  %v2761_v27 = vpop.f32.mrf.mxu3  ;;  %v2019_v0 = vld [vmem:[%s3111_s2 + $0x20] sm:$0xff]  ;;  %s2079_s2 = smov [#allocation6]  }
 0x119   :  { %v744_v8 = vpop.f32.mrf.mxu1  ;;  %v586_v2 = vmul.f32 %v2515_v32, %v367_v49  ;;  %v3172_v32 = vld [vmem:[#allocation12_spill] sm:$0xff]  ;;  %s1742_s16 = sshll.u32 %s2079_s2, 4  ;;  %s1743_s16 = int_to_ptr.vmem [resolvable:$true] %s1742_s16 }
 0x11a   :  { %v2757_v7 = vadd.f32 %v1265_v47, %v2594_v9  ;;  %v931_v54 = vmul.f32 %v2639_v41, %v744_v8  ;;  %v3173_v8 = vld [vmem:[#allocation24_spill] sm:$0xff] }
 0x11b   :  { %406 = vmatmul.bf16.gmra.mxu0 %v1964_v35 }
 0x11c   :  { %v2763_v23 = vadd.f32 %v931_v54, %v586_v2  ;;  %783 = vmatmul.bf16.gmra.mxu1 %v1964_v35  ;;  %v2765_v16 = vpop.permute.xlu1 %902  ;;  %1128 = vmatmul.bf16.gmra.mxu2 %v1964_v35 }
 0x11d   :  { %3170 = vst [vmem:[#allocation56_spill] sm:$0xff] %v2765_v16  ;;  %1496 = vperm.xlu1 %2018, %v2019_v0   ;;  %v2770_v9 = vpop.permute.xlu0 %910 }
 0x11e   :  { %3171 = vst [vmem:[#allocation57_spill] sm:$0xff] %v2770_v9  ;;  %1500 = vperm.xlu2 %2016, %v2162_v22   ;;  %1528 = vperm.xlu0 %2017, %v3172_v32   ;;  %v3175_v32 = vld [vmem:[#allocation10_spill] sm:$0xff] }
 0x11f   :  { %v1156_v41 = vpop.permute.xlu2 %1155  ;;  %1468 = vmatmul.bf16.gmra.mxu3 %v1963_v57  ;;  %v1089_v58 = vpop.f32.mrf.mxu2  ;;  %v3176_v57 = vld [vmem:[#allocation9_spill] sm:$0xff] }
 0x120   :  { %v1267_v19 = vmul.f32 %v1156_v41, %v2627_v25  ;;  %v369_v34 = vpop.f32.mrf.mxu0  ;;  %v2780_v0 = vpop.f32.mrf.mxu3 }
 0x121   :  { %v746_v47 = vpop.f32.mrf.mxu1  ;;  %v587_v2 = vmul.f32 %v3173_v8, %v369_v34 }
 0x122   :  { %v2776_v49 = vadd.f32 %v1267_v19, %v2619_v59  ;;  %v932_v54 = vmul.f32 %v2684_v62, %v746_v47  ;;  %v3177_v59 = vld [vmem:[#allocation30_spill] sm:$0xff] }
 0x124   :  { %v2782_v16 = vadd.f32 %v932_v54, %v587_v2  ;;  %v2784_v22 = vpop.permute.xlu1 %914 }
 0x125   :  { %3174 = vst [vmem:[#allocation12_spill] sm:$0xff] %v2784_v22  ;;  %1508 = vperm.xlu1 %2018, %v3175_v32   ;;  %v3178_v32 = vld [vmem:[#allocation23_spill] sm:$0xff] }
 0x126   :  { %1512 = vperm.xlu2 %2016, %v3176_v57   ;;  %v1140_v25 = vpop.permute.xlu0 %1139  ;;  %1540 = vperm.xlu0 %2017, %v2388_v53  }
 0x127   :  { %v1168_v41 = vpop.permute.xlu2 %1167  ;;  %v1263_v19 = vmul.f32 %v1140_v25, %v3177_v59  ;;  %v2791_v8 = vpop.f32.mrf.mxu2 }
 0x128   :  { %v1270_v34 = vmul.f32 %v1168_v41, %v2671_v26  ;;  %v372_v47 = vpop.f32.mrf.mxu0  ;;  %v2801_v53 = vpop.f32.mrf.mxu3 }
 0x129   :  { %v2794_v62 = vadd.f32 %v1263_v19, %v2632_v45  ;;  %v749_v2 = vpop.f32.mrf.mxu1  ;;  %v588_v57 = vmul.f32 %v3178_v32, %v372_v47  ;;  %v3179_v45 = vld [vmem:[#allocation33_spill] sm:$0xff]  ;;  %v3180_v47 = vld [vmem:[#allocation19_spill] sm:$0xff] }
 0x12a   :  { %v2797_v54 = vadd.f32 %v1270_v34, %v2665_v37  ;;  %v933_v22 = vmul.f32 %v2695_v33, %v749_v2  ;;  %v3181_v32 = vld [vmem:[#allocation11_spill] sm:$0xff] }
 0x12c   :  { %v2803_v51 = vadd.f32 %v933_v22, %v588_v57 }
 0x12d   :  { %1520 = vperm.xlu1 %2018, %v2305_v15   ;;  %v1144_v26 = vpop.permute.xlu1 %1143 }
 0x12e   :  { %1524 = vperm.xlu2 %2016, %v2300_v14   ;;  %v1264_v25 = vmul.f32 %v1144_v26, %v3179_v45  ;;  %1552 = vperm.xlu0 %2017, %v2418_v63  }
 0x12f   :  { %v1180_v41 = vpop.permute.xlu2 %1179  ;;  %1473 = vmatmul.bf16.gmra.mxu3 %v1964_v35  ;;  %v1160_v59 = vpop.permute.xlu0 %1159 }
 0x130   :  { %v2810_v37 = vadd.f32 %v1264_v25, %v2629_v55  ;;  %v1273_v33 = vmul.f32 %v1180_v41, %v2720_v29  ;;  %v2813_v19 = vpop.f32.mrf.mxu2  ;;  %v1268_v22 = vmul.f32 %v1160_v59, %v2645_v50  ;;  %v374_v15 = vpop.f32.mrf.mxu0  ;;  %v3182_v50 = vld [vmem:[#allocation40_spill] sm:$0xff] }
 0x131   :  { %v751_v34 = vpop.f32.mrf.mxu1  ;;  %v589_v2 = vmul.f32 %v3180_v47, %v374_v15  ;;  %v2821_v35 = vpop.f32.mrf.mxu3  ;;  %v3183_v15 = vld [vmem:[#allocation27_spill] sm:$0xff] }
 0x132   :  { %v2817_v14 = vadd.f32 %v1273_v33, %v2710_v40  ;;  %v934_v63 = vmul.f32 %v2654_v42, %v751_v34  ;;  %v2824_v55 = vadd.f32 %v1268_v22, %v2647_v56 }
 0x134   :  { %v966_v29 = vadd.f32 %v934_v63, %v589_v2 }
 0x135   :  { %1532 = vperm.xlu1 %2018, %v3181_v32   ;;  %v1152_v57 = vpop.permute.xlu1 %1151 }
 0x136   :  { %1536 = vperm.xlu2 %2016, %v2348_v38   ;;  %v1266_v26 = vmul.f32 %v1152_v57, %v3182_v50  ;;  %1564 = vperm.xlu0 %2017, %v2436_v6  }
 0x137   :  { %v1192_v40 = vpop.permute.xlu2 %1191  ;;  %v1172_v25 = vpop.permute.xlu0 %1171 }
 0x138   :  { %v2831_v45 = vadd.f32 %v1266_v26, %v2643_v36  ;;  %v1276_v42 = vmul.f32 %v1192_v40, %v1089_v58  ;;  %v1096_v41 = vpop.f32.mrf.mxu2  ;;  %v1271_v56 = vmul.f32 %v1172_v25, %v2687_v52  ;;  %v377_v33 = vpop.f32.mrf.mxu0  ;;  %v3184_v58 = vld [vmem:[#allocation13_spill] sm:$0xff] }
 0x139   :  { %v754_v59 = vpop.f32.mrf.mxu1  ;;  %v590_v38 = vmul.f32 %v3183_v15, %v377_v33  ;;  %v2839_v47 = vpop.f32.mrf.mxu3  ;;  %v3186_v15 = vld [vmem:[#allocation15_spill] sm:$0xff] }
 0x13a   :  { %v2835_v22 = vadd.f32 %v1276_v42, %v2763_v23  ;;  %v935_v34 = vmul.f32 %v2700_v5, %v754_v59  ;;  %v2842_v6 = vadd.f32 %v1271_v56, %v2677_v31  ;;  %v3185_v42 = vld [vmem:[#allocation26_spill] sm:$0xff] }
 0x13c   :  { %v967_v36 = vadd.f32 %v935_v34, %v590_v38 }
 0x13d   :  { %1544 = vperm.xlu1 %2018, %v3184_v58   ;;  %v1164_v2 = vpop.permute.xlu1 %1163 }
 0x13e   :  { %1548 = vperm.xlu2 %2016, %v2378_v48   ;;  %v1269_v52 = vmul.f32 %v1164_v2, %v2659_v1  ;;  %1576 = vperm.xlu0 %2017, %v2454_v10  }
 0x13f   :  { %v1204_v23 = vpop.permute.xlu2 %1203  ;;  %v1184_v32 = vpop.permute.xlu0 %1183 }
 0x140   :  { %v2849_v63 = vadd.f32 %v1269_v52, %v2657_v46  ;;  %v1279_v5 = vmul.f32 %v1204_v23, %v1096_v41  ;;  %v1274_v57 = vmul.f32 %v1184_v32, %v2735_v28  ;;  %v379_v31 = vpop.f32.mrf.mxu0  ;;  %v1099_v40 = vpop.f32.mrf.mxu2  ;;  %v3188_v23 = vld [vmem:[#allocation17_spill] sm:$0xff] }
 0x141   :  { %v756_v50 = vpop.f32.mrf.mxu1  ;;  %v591_v25 = vmul.f32 %v3185_v42, %v379_v31  ;;  %v2856_v1 = vpop.f32.mrf.mxu3 }
 0x142   :  { %v2852_v26 = vadd.f32 %v1279_v5, %v966_v29  ;;  %v936_v48 = vmul.f32 %v2712_v4, %v756_v50  ;;  %v2859_v10 = vadd.f32 %v1274_v57, %v2726_v11 }
 0x144   :  { %v968_v46 = vadd.f32 %v936_v48, %v591_v25  ;;  %v3190_v25 = vld [vmem:[#allocation18_spill] sm:$0xff] }
 0x145   :  { %1556 = vperm.xlu1 %2018, %v2413_v61   ;;  %v1176_v41 = vpop.permute.xlu1 %1175 }
 0x146   :  { %1560 = vperm.xlu2 %2016, %v2408_v60   ;;  %v1272_v28 = vmul.f32 %v1176_v41, %v2703_v43  ;;  %1588 = vperm.xlu0 %2017, %v2472_v13   ;;  %v3187_v43 = vld [vmem:[#allocation14_spill] sm:$0xff] }
 0x147   :  { %v2865_v29 = vpop.permute.xlu2 %1215  ;;  %v1196_v4 = vpop.permute.xlu0 %1195 }
 0x148   :  { %v2868_v56 = vadd.f32 %v1272_v28, %v2693_v39  ;;  %v1277_v33 = vmul.f32 %v1196_v4, %v2791_v8  ;;  %v1101_v61 = vpop.f32.mrf.mxu2 }
 0x149   :  { %v2871_v11 = vpop.f32.mrf.mxu3  ;;  %v2891_v52 = vpop.f32.mrf.mxu1 }
 0x14a   :  { %v2874_v59 = vadd.f32 %v1277_v33, %v2782_v16  ;;  %v2887_v16 = vpop.f32.mrf.mxu0 }
 0x14d   :  { %1568 = vperm.xlu1 %2018, %v3186_v15   ;;  %v1188_v60 = vpop.permute.xlu1 %1187 }
 0x14e   :  { %1572 = vperm.xlu2 %2016, %v3187_v43   ;;  %v1275_v13 = vmul.f32 %v1188_v60, %v2754_v44  ;;  %1600 = vperm.xlu0 %2017, %v2485_v18   ;;  %v3189_v18 = vld [vmem:[#allocation16_spill] sm:$0xff] }
 0x14f   :  { %v2880_v39 = vpop.permute.xlu2 %1227  ;;  %v1208_v8 = vpop.permute.xlu0 %1207 }
 0x150   :  { %v2883_v38 = vadd.f32 %v1275_v13, %v2744_v3  ;;  %v1280_v34 = vmul.f32 %v1208_v8, %v1099_v40  ;;  %v2894_v5 = vpop.f32.mrf.mxu2  ;;  %v3196_v13 = vld [vmem:[#allocation34_spill] sm:$0xff] }
 0x151   :  { %v2885_v58 = vpop.f32.mrf.mxu3  ;;  %v2910_v42 = vpop.f32.mrf.mxu1 }
 0x152   :  { %v2889_v2 = vadd.f32 %v1280_v34, %v967_v36  ;;  %v2907_v50 = vpop.f32.mrf.mxu0 }
 0x155   :  { %1580 = vperm.xlu1 %2018, %v3188_v23   ;;  %v1200_v44 = vpop.permute.xlu1 %1199 }
 0x156   :  { %1584 = vperm.xlu2 %2016, %v3189_v18   ;;  %v1278_v3 = vmul.f32 %v1200_v44, %v2813_v19 }
 0x157   :  { %v2898_v32 = vpop.permute.xlu2 %1239  ;;  %v2903_v31 = vpop.permute.xlu0 %1219 }
 0x158   :  { %v2901_v57 = vadd.f32 %v1278_v3, %v2803_v51  ;;  %v2915_v41 = vpop.f32.mrf.mxu2 }
 0x159   :  { %v2905_v36 = vpop.f32.mrf.mxu3  ;;  %v2928_v15 = vpop.f32.mrf.mxu1 }
 0x15a   :  { %3194 = vst [vmem:[#allocation30_spill] sm:$0xff] %v2928_v15 }
 0x15d   :  { %1592 = vperm.xlu1 %2018, %v2467_v12   ;;  %v1212_v40 = vpop.permute.xlu1 %1211  ;;  %v2926_v12 = vpop.f32.mrf.mxu0 }
 0x15e   :  { %1596 = vperm.xlu2 %2016, %v3190_v25   ;;  %v1281_v48 = vmul.f32 %v1212_v40, %v1101_v61  ;;  %3193 = vst [vmem:[#allocation9_spill] sm:$0xff] %v2926_v12  ;;  %v3199_v40 = vld [vmem:[#allocation42_spill] sm:$0xff] }
 0x15f   :  { %v2913_v19 = vpop.permute.xlu2 %1251  ;;  %v2919_v28 = vpop.permute.xlu0 %1231 }
 0x160   :  { %v2917_v51 = vadd.f32 %v1281_v48, %v968_v46  ;;  %v2932_v43 = vpop.f32.mrf.mxu2 }
 0x161   :  { %v2921_v4 = vpop.f32.mrf.mxu3  ;;  %3195 = vst [vmem:[#allocation23_spill] sm:$0xff] %v2932_v43  ;;  %v2944_v3 = vpop.f32.mrf.mxu1 }
 0x162   :  { %3191 = vst [vmem:[#allocation24_spill] sm:$0xff] %v2917_v51 }
 0x165   :  { %1604 = vperm.xlu1 %2018, %v2480_v17   ;;  %v2924_v33 = vpop.permute.xlu1 %1223  ;;  %v2942_v44 = vpop.f32.mrf.mxu0 }
 0x166   :  { %3192 = vst [vmem:[#allocation10_spill] sm:$0xff] %v2924_v33 }
 0x167   :  { %v2930_v60 = vpop.permute.xlu0 %1243 }
 0x168   :  { %v1481_v61 = vpop.permute.xlu2 %1480  ;;  %v2949_v9 = vpop.f32.mrf.mxu2 }
 0x169   :  { %v1607_v46 = vmul.f32 %v1481_v61, %v3196_v13  ;;  %v2935_v8 = vpop.f32.mrf.mxu3 }
 0x16b   :  { %v1639_v34 = vadd.f32 %v1607_v46, %v2738_v21 }
 0x16d   :  { %v2938_v23 = vpop.permute.xlu1 %1235  ;;  %1706 = vst [vmem:[#allocation6] sm:$0xff] %v1639_v34  ;;  %v3202_v34 = vld [vmem:[#allocation44_spill] sm:$0xff]  ;;  %v2956_v43 = vpop.f32.mrf.mxu0 }
 0x16e   :  { %3197 = vst [vmem:[#allocation33_spill] sm:$0xff] %v2938_v23 }
 0x16f   :  { %v2940_v17 = vpop.permute.xlu0 %1255 }
 0x170   :  { %3198 = vst [vmem:[#allocation19_spill] sm:$0xff] %v2940_v17  ;;  %v1493_v18 = vpop.permute.xlu2 %1492  ;;  %v3203_v17 = vld [vmem:[#allocation37_spill] sm:$0xff] }
 0x171   :  { %v1610_v25 = vmul.f32 %v1493_v18, %v3199_v40  ;;  %v2947_v48 = vpop.f32.mrf.mxu3  ;;  %v2960_v18 = vpop.f32.mrf.mxu1 }
 0x172   :  { %3200 = vst [vmem:[#allocation11_spill] sm:$0xff] %v2947_v48 }
 0x173   :  { %v1642_v61 = vadd.f32 %v1610_v25, %v2757_v7  ;;  %v2966_v25 = vpop.f32.mrf.mxu2 }
 0x175   :  { %v2952_v13 = vpop.permute.xlu1 %1247  ;;  %1709 = vst [vmem:[#allocation6 + $0x18] sm:$0xff] %v1642_v61 }
 0x176   :  { %3201 = vst [vmem:[#allocation40_spill] sm:$0xff] %v2952_v13 }
 0x178   :  { %v1501_v21 = vpop.permute.xlu2 %1500  ;;  %v1485_v46 = vpop.permute.xlu0 %1484 }
 0x179   :  { %v1612_v23 = vmul.f32 %v1501_v21, %v3202_v34  ;;  %v1608_v33 = vmul.f32 %v1485_v46, %v3203_v17  ;;  %v2958_v51 = vpop.f32.mrf.mxu3  ;;  %v3205_v34 = vld [vmem:[#allocation50_spill] sm:$0xff] }
 0x17a   :  { %v3206_v46 = vld [vmem:[#allocation46_spill] sm:$0xff] }
 0x17b   :  { %v1644_v40 = vadd.f32 %v1612_v23, %v2776_v49  ;;  %v1640_v48 = vadd.f32 %v1608_v33, %v2794_v62  ;;  %v2974_v23 = vpop.f32.mrf.mxu0  ;;  %v2976_v62 = vpop.f32.mrf.mxu1 }
 0x17d   :  { %v2964_v7 = vpop.permute.xlu1 %1259  ;;  %1711 = vst [vmem:[#allocation6 + $0x28] sm:$0xff] %v1644_v40 }
 0x17e   :  { %3204 = vst [vmem:[#allocation27_spill] sm:$0xff] %v2964_v7  ;;  %v2979_v7 = vpop.f32.mrf.mxu2 }
 0x17f   :  { %1707 = vst [vmem:[#allocation6 + $0x8] sm:$0xff] %v1640_v48  ;;  %v3207_v48 = vld [vmem:[#allocation41_spill] sm:$0xff] }
 0x180   :  { %v1513_v61 = vpop.permute.xlu2 %1512  ;;  %v1505_v21 = vpop.permute.xlu0 %1504 }
 0x181   :  { %v1615_v17 = vmul.f32 %v1513_v61, %v3205_v34  ;;  %v1613_v13 = vmul.f32 %v1505_v21, %v3206_v46  ;;  %v2970_v15 = vpop.f32.mrf.mxu3 }
 0x183   :  { %v1647_v12 = vadd.f32 %v1615_v17, %v2797_v54  ;;  %v1645_v49 = vadd.f32 %v1613_v13, %v2824_v55 }
 0x185   :  { %1714 = vst [vmem:[#allocation6 + $0x40] sm:$0xff] %v1647_v12 }
 0x186   :  { %v1489_v33 = vpop.permute.xlu1 %1488  ;;  %1712 = vst [vmem:[#allocation6 + $0x30] sm:$0xff] %v1645_v49  ;;  %v2988_v49 = vpop.f32.mrf.mxu0 }
 0x187   :  { %v1609_v40 = vmul.f32 %v1489_v33, %v3207_v48  ;;  %v2990_v33 = vpop.f32.mrf.mxu1 }
 0x188   :  { %v1525_v21 = vpop.permute.xlu2 %1524  ;;  %v1517_v34 = vpop.permute.xlu0 %1516 }
 0x189   :  { %v1641_v61 = vadd.f32 %v1609_v40, %v2810_v37  ;;  %v1618_v46 = vmul.f32 %v1525_v21, %v2761_v27  ;;  %v1616_v54 = vmul.f32 %v1517_v34, %v2723_v20  ;;  %v2986_v12 = vpop.f32.mrf.mxu3  ;;  %v3209_v37 = vld [vmem:[#allocation43_spill] sm:$0xff]  ;;  %v2993_v21 = vpop.f32.mrf.mxu2 }
 0x18a   :  { %3208 = vst [vmem:[#allocation13_spill] sm:$0xff] %v2986_v12 }
 0x18b   :  { %1708 = vst [vmem:[#allocation6 + $0x10] sm:$0xff] %v1641_v61  ;;  %v1650_v55 = vadd.f32 %v1618_v46, %v2817_v14  ;;  %v1648_v13 = vadd.f32 %v1616_v54, %v2842_v6 }
 0x18d   :  { %1717 = vst [vmem:[#allocation6 + $0x58] sm:$0xff] %v1650_v55  ;;  %v3210_v55 = vld [vmem:[#allocation48_spill] sm:$0xff] }
 0x18e   :  { %1715 = vst [vmem:[#allocation6 + $0x48] sm:$0xff] %v1648_v13  ;;  %v3003_v12 = vpop.f32.mrf.mxu0 }
 0x18f   :  { %v1497_v17 = vpop.permute.xlu1 %1496 }
 0x190   :  { %v1611_v48 = vmul.f32 %v1497_v17, %v3209_v37  ;;  %v1537_v40 = vpop.permute.xlu2 %1536  ;;  %v1529_v27 = vpop.permute.xlu0 %1528 }
 0x191   :  { %v1621_v14 = vmul.f32 %v1537_v40, %v2821_v35  ;;  %v1619_v6 = vmul.f32 %v1529_v27, %v2780_v0  ;;  %v3212_v40 = vld [vmem:[#allocation45_spill] sm:$0xff] }
 0x192   :  { %v1643_v20 = vadd.f32 %v1611_v48, %v2831_v45  ;;  %v3000_v46 = vpop.f32.mrf.mxu3  ;;  %v3005_v45 = vpop.f32.mrf.mxu1  ;;  %v937_v27 = vmul.f32 %v3212_v40, %v2891_v52 }
 0x193   :  { %v1653_v61 = vadd.f32 %v1621_v14, %v2835_v22  ;;  %v1651_v34 = vadd.f32 %v1619_v6, %v2859_v10  ;;  %v3211_v10 = vld [vmem:[#allocation20_spill] sm:$0xff] }
 0x194   :  { %1710 = vst [vmem:[#allocation6 + $0x20] sm:$0xff] %v1643_v20  ;;  %v592_v48 = vmul.f32 %v3211_v10, %v2887_v16  ;;  %v3014_v20 = vpop.f32.mrf.mxu2 }
 0x195   :  { %1720 = vst [vmem:[#allocation6 + $0x70] sm:$0xff] %v1653_v61 }
 0x196   :  { %1718 = vst [vmem:[#allocation6 + $0x60] sm:$0xff] %v1651_v34 }
 0x197   :  { %v1509_v54 = vpop.permute.xlu1 %1508 }
 0x198   :  { %v1614_v13 = vmul.f32 %v1509_v54, %v3210_v55  ;;  %v1549_v17 = vpop.permute.xlu2 %1548  ;;  %v1541_v37 = vpop.permute.xlu0 %1540 }
 0x199   :  { %v1624_v35 = vmul.f32 %v1549_v17, %v2871_v11  ;;  %v1622_v22 = vmul.f32 %v1541_v37, %v2839_v47  ;;  %v969_v47 = vadd.f32 %v937_v27, %v592_v48  ;;  %v3215_v37 = vld [vmem:[#allocation21_spill] sm:$0xff] }
 0x19a   :  { %v1646_v0 = vadd.f32 %v1614_v13, %v2849_v63  ;;  %v1282_v63 = vmul.f32 %v2865_v29, %v2894_v5  ;;  %v3021_v16 = vpop.f32.mrf.mxu3  ;;  %v3213_v13 = vld [vmem:[#allocation29_spill] sm:$0xff]  ;;  %v3214_v5 = vld [vmem:[#allocation52_spill] sm:$0xff]  ;;  %v3036_v10 = vpop.f32.mrf.mxu1 }
 0x19b   :  { %v1656_v14 = vadd.f32 %v1624_v35, %v2852_v26  ;;  %v1654_v6 = vadd.f32 %v1622_v22, %v2874_v59  ;;  %v593_v29 = vmul.f32 %v3213_v13, %v2907_v50  ;;  %v938_v17 = vmul.f32 %v3214_v5, %v2910_v42  ;;  %v3034_v22 = vpop.f32.mrf.mxu0 }
 0x19c   :  { %1713 = vst [vmem:[#allocation6 + $0x38] sm:$0xff] %v1646_v0  ;;  %v1314_v54 = vadd.f32 %v1282_v63, %v969_v47  ;;  %v3216_v0 = vld [vmem:[#allocation47_spill] sm:$0xff]  ;;  %v1283_v50 = vmul.f32 %v2903_v31, %v2915_v41  ;;  %v1285_v42 = vmul.f32 %v2880_v39, %v2949_v9  ;;  %v3217_v9 = vld [vmem:[#allocation32_spill] sm:$0xff] }
 0x19d   :  { %1723 = vst [vmem:[#allocation6 + $0x88] sm:$0xff] %v1656_v14  ;;  %v940_v35 = vmul.f32 %v3216_v0, %v2944_v3  ;;  %v596_v39 = vmul.f32 %v3217_v9, %v2956_v43  ;;  %v1288_v43 = vmul.f32 %v2898_v32, %v2993_v21  ;;  %v944_v0 = vmul.f32 %v2749_v24, %v3005_v45 }
 0x19e   :  { %1721 = vst [vmem:[#allocation6 + $0x78] sm:$0xff] %v1654_v6 }
 0x19f   :  { %v1521_v11 = vpop.permute.xlu1 %1520 }
 0x1a0   :  { %v1617_v61 = vmul.f32 %v1521_v11, %v2742_v30  ;;  %v1561_v34 = vpop.permute.xlu2 %1560  ;;  %v1553_v52 = vpop.permute.xlu0 %1552  ;;  %v595_v30 = vmul.f32 %v3215_v37, %v2942_v44  ;;  %v970_v44 = vadd.f32 %v938_v17, %v593_v29  ;;  %v3218_v11 = vld [vmem:[#allocation54_spill] sm:$0xff] }
 0x1a1   :  { %v1627_v26 = vmul.f32 %v1561_v34, %v2921_v4  ;;  %v1625_v59 = vmul.f32 %v1553_v52, %v2885_v58  ;;  %v3043_v4 = vpop.f32.mrf.mxu2  ;;  %v941_v47 = vmul.f32 %v3218_v11, %v2960_v18  ;;  %v3220_v52 = vld [vmem:[#allocation49_spill] sm:$0xff] }
 0x1a2   :  { %v1649_v55 = vadd.f32 %v1617_v61, %v2868_v56  ;;  %v972_v48 = vadd.f32 %v940_v35, %v595_v30  ;;  %v1315_v27 = vadd.f32 %v1283_v50, %v970_v44  ;;  %v3053_v61 = vpop.f32.mrf.mxu3  ;;  %v3222_v35 = vld [vmem:[#allocation25_spill] sm:$0xff] }
 0x1a3   :  { %v1659_v56 = vadd.f32 %v1627_v26, %v1314_v54  ;;  %v1657_v58 = vadd.f32 %v1625_v59, %v2889_v2  ;;  %v943_v54 = vmul.f32 %v3220_v52, %v2990_v33  ;;  %v781_v26 = vpop.f32.mrf.mxu1  ;;  %v973_v18 = vadd.f32 %v941_v47, %v596_v39  ;;  %v3229_v47 = vld [vmem:[#allocation23_spill] sm:$0xff] }
 0x1a4   :  { %1716 = vst [vmem:[#allocation6 + $0x50] sm:$0xff] %v1649_v55  ;;  %v1317_v63 = vadd.f32 %v1285_v42, %v972_v48 }
 0x1a5   :  { %1726 = vst [vmem:[#allocation6 + $0xa0] sm:$0xff] %v1659_v56 }
 0x1a6   :  { %1724 = vst [vmem:[#allocation6 + $0x90] sm:$0xff] %v1657_v58  ;;  %v3223_v58 = vld [vmem:[#allocation51_spill] sm:$0xff] }
 0x1a7   :  { %v1533_v3 = vpop.permute.xlu1 %1532 }
 0x1a8   :  { %v1620_v40 = vmul.f32 %v1533_v3, %v2801_v53  ;;  %v1573_v14 = vpop.permute.xlu2 %1572  ;;  %v1565_v6 = vpop.permute.xlu0 %1564  ;;  %v3219_v53 = vld [vmem:[#allocation22_spill] sm:$0xff] }
 0x1a9   :  { %v1630_v31 = vmul.f32 %v1573_v14, %v2958_v51  ;;  %v1628_v41 = vmul.f32 %v1565_v6, %v2935_v8  ;;  %v598_v34 = vmul.f32 %v3219_v53, %v2988_v49  ;;  %v1286_v51 = vmul.f32 %v2919_v28, %v2966_v25  ;;  %v404_v8 = vpop.f32.mrf.mxu0  ;;  %v1126_v49 = vpop.f32.mrf.mxu2  ;;  %v3221_v25 = vld [vmem:[#allocation36_spill] sm:$0xff]  ;;  %v3226_v6 = vld [vmem:[#allocation30_spill] sm:$0xff] }
 0x1aa   :  { %v1652_v2 = vadd.f32 %v1620_v40, %v2883_v38  ;;  %v599_v21 = vmul.f32 %v3221_v25, %v3003_v12  ;;  %v601_v56 = vmul.f32 %v3222_v35, %v404_v8  ;;  %v1471_v44 = vpop.f32.mrf.mxu3  ;;  %v3224_v40 = vld [vmem:[#allocation9_spill] sm:$0xff]  ;;  %v3230_v53 = vld [vmem:[#allocation10_spill] sm:$0xff] }
 0x1ab   :  { %v1662_v38 = vadd.f32 %v1630_v31, %v1317_v63  ;;  %v1660_v55 = vadd.f32 %v1628_v41, %v1315_v27  ;;  %v975_v13 = vadd.f32 %v943_v54, %v598_v34  ;;  %v1318_v33 = vadd.f32 %v1286_v51, %v973_v18  ;;  %v784_v24 = vpop.f32.mrf.mxu1  ;;  %v3225_v27 = vld [vmem:[#allocation28_spill] sm:$0xff]  ;;  %v3227_v63 = vld [vmem:[#allocation53_spill] sm:$0xff] }
 0x1ac   :  { %1719 = vst [vmem:[#allocation6 + $0x68] sm:$0xff] %v1652_v2  ;;  %v594_v14 = vmul.f32 %v3225_v27, %v3224_v40  ;;  %v939_v2 = vmul.f32 %v3227_v63, %v3226_v6  ;;  %v1284_v34 = vmul.f32 %v3230_v53, %v3229_v47  ;;  %v3242_v6 = vld [vmem:[#allocation38_spill] sm:$0xff] }
 0x1ad   :  { %1729 = vst [vmem:[#allocation6 + $0xb8] sm:$0xff] %v1662_v38  ;;  %v1320_v37 = vadd.f32 %v1288_v43, %v975_v13  ;;  %v3232_v38 = vld [vmem:[#allocation57_spill] sm:$0xff] }
 0x1ae   :  { %1727 = vst [vmem:[#allocation6 + $0xa8] sm:$0xff] %v1660_v55  ;;  %v947_v55 = vmul.f32 %v3232_v38, %v784_v24  ;;  %v971_v8 = vadd.f32 %v939_v2, %v594_v14  ;;  %v3243_v2 = vld [vmem:[#allocation12_spill] sm:$0xff] }
 0x1af   :  { %v1545_v59 = vpop.permute.xlu1 %1544 }
 0x1b0   :  { %v1623_v29 = vmul.f32 %v1545_v59, %v2856_v1  ;;  %v1585_v5 = vpop.permute.xlu2 %1584  ;;  %v1577_v17 = vpop.permute.xlu0 %1576  ;;  %v946_v1 = vmul.f32 %v3223_v58, %v781_v26  ;;  %v3233_v26 = vld [vmem:[#allocation19_spill] sm:$0xff] }
 0x1b1   :  { %v1633_v28 = vmul.f32 %v1585_v5, %v3000_v46  ;;  %v1631_v32 = vmul.f32 %v1577_v17, %v2970_v15  ;;  %v1291_v46 = vmul.f32 %v2913_v19, %v1126_v49  ;;  %v976_v15 = vadd.f32 %v944_v0, %v599_v21  ;;  %v407_v48 = vpop.f32.mrf.mxu0  ;;  %v3228_v19 = vld [vmem:[#allocation24_spill] sm:$0xff]  ;;  %v1129_v52 = vpop.f32.mrf.mxu2  ;;  %v3235_v5 = vld [vmem:[#allocation31_spill] sm:$0xff]  ;;  %v3237_v0 = vld [vmem:[#allocation33_spill] sm:$0xff] }
 0x1b2   :  { %v1655_v30 = vadd.f32 %v1623_v29, %v2901_v57  ;;  %v1289_v57 = vmul.f32 %v2930_v60, %v3014_v20  ;;  %v978_v3 = vadd.f32 %v946_v1, %v601_v56  ;;  %v1292_v18 = vmul.f32 %v3233_v26, %v1129_v52  ;;  %v1474_v13 = vpop.f32.mrf.mxu3  ;;  %v3234_v29 = vld [vmem:[#allocation11_spill] sm:$0xff] }
 0x1b3   :  { %v1665_v50 = vadd.f32 %v1633_v28, %v1320_v37  ;;  %v1663_v42 = vadd.f32 %v1631_v32, %v1318_v33  ;;  %v597_v17 = vmul.f32 %v3235_v5, %v2974_v23  ;;  %v1287_v35 = vmul.f32 %v3237_v0, %v2979_v7  ;;  %v3239_v23 = vld [vmem:[#allocation35_spill] sm:$0xff]  ;;  %v786_v24 = vpop.f32.mrf.mxu1 }
 0x1b4   :  { %1722 = vst [vmem:[#allocation6 + $0x80] sm:$0xff] %v1655_v30  ;;  %v1321_v31 = vadd.f32 %v1289_v57, %v976_v15  ;;  %v1323_v41 = vadd.f32 %v1291_v46, %v978_v3  ;;  %v3236_v30 = vld [vmem:[#allocation55_spill] sm:$0xff]  ;;  %v3240_v46 = vld [vmem:[#allocation56_spill] sm:$0xff] }
 0x1b5   :  { %1732 = vst [vmem:[#allocation6 + $0xd0] sm:$0xff] %v1665_v50  ;;  %v942_v28 = vmul.f32 %v3236_v30, %v2976_v62  ;;  %v945_v62 = vmul.f32 %v3240_v46, %v3036_v10 }
 0x1b6   :  { %1730 = vst [vmem:[#allocation6 + $0xc0] sm:$0xff] %v1663_v42  ;;  %v3238_v42 = vld [vmem:[#allocation13_spill] sm:$0xff] }
 0x1b7   :  { %v1557_v12 = vpop.permute.xlu1 %1556  ;;  %v974_v58 = vadd.f32 %v942_v28, %v597_v17 }
 0x1b8   :  { %v1626_v45 = vmul.f32 %v1557_v12, %v2905_v36  ;;  %v1597_v60 = vpop.permute.xlu2 %1596  ;;  %v1589_v20 = vpop.permute.xlu0 %1588  ;;  %v3231_v36 = vld [vmem:[#allocation39_spill] sm:$0xff]  ;;  %v3241_v12 = vld [vmem:[#allocation40_spill] sm:$0xff] }
 0x1b9   :  { %v1634_v39 = vmul.f32 %v1589_v20, %v3021_v16  ;;  %v1636_v11 = vmul.f32 %v1597_v60, %v1471_v44  ;;  %v602_v54 = vmul.f32 %v3231_v36, %v407_v48  ;;  %v1316_v16 = vadd.f32 %v1284_v34, %v971_v8  ;;  %v409_v48 = vpop.f32.mrf.mxu0  ;;  %v1131_v14 = vpop.f32.mrf.mxu2  ;;  %v3244_v60 = vld [vmem:[#allocation27_spill] sm:$0xff] }
 0x1ba   :  { %v1658_v9 = vadd.f32 %v1626_v45, %v3228_v19  ;;  %v1319_v50 = vadd.f32 %v1287_v35, %v974_v58  ;;  %v600_v44 = vmul.f32 %v3239_v23, %v3034_v22  ;;  %v1290_v3 = vmul.f32 %v3241_v12, %v3043_v4  ;;  %v1476_v4 = vpop.f32.mrf.mxu3 }
 0x1bb   :  { %v1666_v51 = vadd.f32 %v1634_v39, %v1321_v31  ;;  %v1668_v43 = vadd.f32 %v1636_v11, %v1323_v41  ;;  %v979_v49 = vadd.f32 %v947_v55, %v602_v54  ;;  %v603_v63 = vmul.f32 %v3242_v6, %v409_v48 }
 0x1bc   :  { %1725 = vst [vmem:[#allocation6 + $0x98] sm:$0xff] %v1658_v9  ;;  %v977_v7 = vadd.f32 %v945_v62, %v600_v44  ;;  %v948_v22 = vmul.f32 %v3243_v2, %v786_v24  ;;  %v1293_v10 = vmul.f32 %v3244_v60, %v1131_v14 }
 0x1bd   :  { %1733 = vst [vmem:[#allocation6 + $0xd8] sm:$0xff] %v1666_v51  ;;  %v1324_v32 = vadd.f32 %v1292_v18, %v979_v49 }
 0x1be   :  { %1735 = vst [vmem:[#allocation6 + $0xe8] sm:$0xff] %v1668_v43  ;;  %v1322_v40 = vadd.f32 %v1290_v3, %v977_v7  ;;  %v980_v20 = vadd.f32 %v948_v22, %v603_v63 }
 0x1bf   :  { %v1569_v59 = vpop.permute.xlu1 %1568 }
 0x1c0   :  { %v1629_v33 = vmul.f32 %v1569_v59, %v3234_v29  ;;  %v1601_v37 = vpop.permute.xlu0 %1600  ;;  %v1325_v19 = vadd.f32 %v1293_v10, %v980_v20 }
 0x1c1   :  { %v1637_v21 = vmul.f32 %v1601_v37, %v1474_v13 }
 0x1c2   :  { %v1661_v25 = vadd.f32 %v1629_v33, %v1316_v16 }
 0x1c3   :  { %v1669_v56 = vadd.f32 %v1637_v21, %v1324_v32 }
 0x1c4   :  { %1728 = vst [vmem:[#allocation6 + $0xb0] sm:$0xff] %v1661_v25 }
 0x1c5   :  { %1736 = vst [vmem:[#allocation6 + $0xf0] sm:$0xff] %v1669_v56 }
 0x1c7   :  { %v1581_v1 = vpop.permute.xlu1 %1580 }
 0x1c8   :  { %v1632_v57 = vmul.f32 %v1581_v1, %v3238_v42 }
 0x1ca   :  { %v1664_v15 = vadd.f32 %v1632_v57, %v1319_v50 }
 0x1cc   :  { %1731 = vst [vmem:[#allocation6 + $0xc8] sm:$0xff] %v1664_v15 }
 0x1cf   :  { %v1593_v45 = vpop.permute.xlu1 %1592 }
 0x1d0   :  { %v1635_v27 = vmul.f32 %v1593_v45, %v3053_v61 }
 0x1d2   :  { %v1667_v31 = vadd.f32 %v1635_v27, %v1322_v40 }
 0x1d4   :  { %1734 = vst [vmem:[#allocation6 + $0xe0] sm:$0xff] %v1667_v31 }
 0x1d7   :  { %v1605_v41 = vpop.permute.xlu1 %1604 }
 0x1d8   :  { %v1638_v61 = vmul.f32 %v1605_v41, %v1476_v4 }
 0x1da   :  { %v1670_v9 = vadd.f32 %v1638_v61, %v1325_v19 }
 0x1dc   :  { %1737 = vst [vmem:[#allocation6 + $0xf8] sm:$0xff] %v1670_v9 }
 0x1dd   :  { %1750 = dma.vmem_to_hbm [thread:$0]  %s1743_s16, 4096, %s1745_s19, [#allocation5], %s2080_s20, %s2080_s20, %s2081_s1  }
 0x1de   :  { %2070 = dma.done.wait [#allocation5], 4096  }
 0x1df   :  { %2071 = vsyncadd [#allocation5], 4294963200 }
 0x1e0   :  { %1755 = vsyncpa [#allocation4], 1 }
 0x1e1   :  { %1756 = vsyncpa [#allocation5], 1 }

</bundles_post_ra>
